<compile_context>
chip_gen: v5e
topology: v5e:2x2
jax: 0.10.0
libtpu: 0.0.40
codegen_flags: <defaults>
</compile_context>

<pallas_src>
import functools

import jax
import jax.numpy as jnp
from jax.experimental import pallas as pl
from jax.experimental.pallas import tpu as pltpu

LEAKY_SLOPE = 0.2
BN_EPS = 1e-5
KW = 4       # kernel_size of every conv in NLayerDiscriminator
PADW = 1     # padding of every conv

TM_TARGET = 2048   # max M-tile rows
ALIGN_M = 16       # M-tile alignment (bf16-friendly sublane packing)


def _round_up(x, m):
    return (x + m - 1) // m * m


def _vmem_budget():
    """Scoped-VMEM budget: 3/4 of physical VMEM; conservative 48 MiB fallback."""
    try:
        phys = int(pltpu.get_tpu_info().vmem_capacity_bytes)
    except Exception:
        phys = 64 * 1024 * 1024          # v7x-sized fallback -> safe everywhere
    return max(32 * 1024 * 1024, (phys * 3) // 4)


def _choose_tm(m, k, c_pad, out_bytes, budget):
    """Largest M tile whose double-buffered footprint fits the VMEM budget."""
    # resident full-K weight (conservatively counted twice) + stats + slack
    fixed = 2 * k * c_pad * 2 + 2 * 8 * c_pad * 4 + (4 << 20)
    # double-buffered bf16 patch rows + double-buffered output rows
    per_row = 2 * k * 2 + 2 * c_pad * out_bytes
    tm = (budget - fixed) // per_row
    tm = int(min(TM_TARGET, max(ALIGN_M, tm)))
    tm -= tm % ALIGN_M
    # keep >= 2 M tiles so the "parallel" axis can shard over v7x's two TCs
    tm = min(tm, _round_up((m + 1) // 2, ALIGN_M))
    return max(tm, ALIGN_M)


# ----------------------------------------------------------------------------
# Pallas kernels
# ----------------------------------------------------------------------------
def _conv_bias_act_kernel(x_ref, w_ref, b_ref, o_ref, *, act):
    """One-shot (tm, K) x (K, C) matmul; bias (+ LeakyReLU) epilogue; bf16/f32 store."""
    y = jnp.dot(x_ref[...], w_ref[...], preferred_element_type=jnp.float32)
    y = y + b_ref[...]
    if act:
        y = jnp.where(y >= 0, y, LEAKY_SLOPE * y)
    o_ref[...] = y.astype(o_ref.dtype)


def _conv_bn_stats_kernel(x_ref, w_ref, o_ref, stats_ref):
    """Conv matmul (no bias) that also emits per-tile BN partial statistics.

    stats block (8, C): row 0 = per-channel sum over this M tile, row 1 =
    per-channel sum of squares, rows 2..7 = 0.  Zero-padded M rows produce
    all-zero conv outputs (bias-free path) and therefore contribute exactly 0.
    """
    y = jnp.dot(x_ref[...], w_ref[...], preferred_element_type=jnp.float32)
    o_ref[...] = y.astype(o_ref.dtype)
    s = jnp.sum(y, axis=0, keepdims=True)           # (1, C)
    sq = jnp.sum(y * y, axis=0, keepdims=True)      # (1, C)
    rows = jax.lax.broadcasted_iota(jnp.int32, stats_ref.shape, 0)
    stats_ref[...] = jnp.where(rows == 0, s, jnp.where(rows == 1, sq, 0.0))


# ----------------------------------------------------------------------------
# Glue: patch construction (with lazily fused BN+LeakyReLU) + pallas_call wrappers
# ----------------------------------------------------------------------------
def _im2col(x_nhwc, prenorm, stride):
    """Build (M, 16*C) bf16 patches.  If prenorm=(scale, shift) is given, the
    previous layer's folded BatchNorm scale+shift and LeakyReLU are applied
    BEFORE spatial zero-padding (exact border semantics), fused by XLA into the
    patch materialization that must happen anyway."""
    n, h, w, c = x_nhwc.shape
    x = x_nhwc
    if prenorm is not None:
        scale, shift = prenorm
        x = x.astype(jnp.float32) * scale.reshape(1, 1, 1, -1) + shift.reshape(1, 1, 1, -1)
        x = jnp.where(x >= 0, x, LEAKY_SLOPE * x)
    x = x.astype(jnp.bfloat16)
    xp = jnp.pad(x, ((0, 0), (PADW, PADW), (PADW, PADW), (0, 0)))
    ho = (h + 2 * PADW - KW) // stride + 1
    wo = (w + 2 * PADW - KW) // stride + 1
    cols = [xp[:, i:i + stride * ho:stride, j:j + stride * wo:stride, :]
            for i in range(KW) for j in range(KW)]
    patches = jnp.stack(cols, axis=-2)               # (N, Ho, Wo, 16, C)
    return patches.reshape(n * ho * wo, KW * KW * c), (n, ho, wo)


def conv2d_pallas(x_nhwc, prenorm, w_mat, b_vec, stride, *, act, with_stats, out_dtype):
    """4x4 conv as a tiled Pallas matmul with a VMEM-resident full-K weight.

    Returns (y, stats, (n, ho, wo)); y is (M_pad, C_pad) in out_dtype.
    If with_stats: y is the raw conv output and stats holds per-M-tile channel
    sum / sumsq partials (bias is NOT applied so padded rows contribute 0).
    Otherwise bias (+ optional LeakyReLU) is fused into the kernel epilogue.
    """
    patches, (n, ho, wo) = _im2col(x_nhwc, prenorm, stride)
    m, k = patches.shape                              # k = 16 * Cin (un-padded)
    c_pad = w_mat.shape[1]

    budget = _vmem_budget()
    tm = _choose_tm(m, k, c_pad, jnp.dtype(out_dtype).itemsize, budget)
    m_pad = _round_up(m, tm)
    num_m = m_pad // tm
    if m_pad > m:
        patches = jnp.pad(patches, ((0, m_pad - m), (0, 0)))

    x_spec = pl.BlockSpec((tm, k), lambda i: (i, 0))
    w_spec = pl.BlockSpec((k, c_pad), lambda i: (0, 0))     # resident across the grid
    y_spec = pl.BlockSpec((tm, c_pad), lambda i: (i, 0))
    cparams = pltpu.CompilerParams(dimension_semantics=("parallel",),
                                   vmem_limit_bytes=int(budget))

    if with_stats:
        y, stats = pl.pallas_call(
            _conv_bn_stats_kernel,
            out_shape=(jax.ShapeDtypeStruct((m_pad, c_pad), out_dtype),
                       jax.ShapeDtypeStruct((num_m * 8, c_pad), jnp.float32)),
            grid_spec=pltpu.PrefetchScalarGridSpec(
                num_scalar_prefetch=0, grid=(num_m,),
                in_specs=[x_spec, w_spec],
                out_specs=[y_spec, pl.BlockSpec((8, c_pad), lambda i: (i, 0))]),
            compiler_params=cparams,
        )(patches, w_mat)
        return y, stats, (n, ho, wo)

    y = pl.pallas_call(
        functools.partial(_conv_bias_act_kernel, act=act),
        out_shape=jax.ShapeDtypeStruct((m_pad, c_pad), out_dtype),
        grid_spec=pltpu.PrefetchScalarGridSpec(
            num_scalar_prefetch=0, grid=(num_m,),
            in_specs=[x_spec, w_spec, pl.BlockSpec((1, c_pad), lambda i: (0, 0))],
            out_specs=y_spec),
        compiler_params=cparams,
    )(patches, w_mat, b_vec)
    return y, None, (n, ho, wo)


def _fold_bn(stats, count, gamma, beta, cout):
    """Reduce per-tile partials -> training-mode BN folded into scale+shift."""
    part = stats.reshape(-1, 8, stats.shape[-1])
    ssum = jnp.sum(part[:, 0, :cout], axis=0)
    ssq = jnp.sum(part[:, 1, :cout], axis=0)
    mean = ssum / count
    # single-pass E[x^2]-E[x]^2 in f32 (clamped); fine at these magnitudes.
    var = jnp.maximum(ssq / count - mean * mean, 0.0)
    scale = gamma.astype(jnp.float32) * jax.lax.rsqrt(var + BN_EPS)
    shift = beta.astype(jnp.float32) - mean * scale
    return scale, shift


# ----------------------------------------------------------------------------
# Model: parameter construction + forward
# ----------------------------------------------------------------------------
def _prepack_weight(w_oihw, bias):
    """Hoisted weight repack: (Cout,Cin,4,4) -> (16*Cin, Cout_pad) bf16 + padded bias."""
    cout, cin, kh, kw = w_oihw.shape
    k = kh * kw * cin
    c_pad = _round_up(cout, 128)
    wm = jnp.transpose(w_oihw, (2, 3, 1, 0)).reshape(k, cout)   # (kh, kw, cin) taps, cin fastest
    wm = jnp.pad(wm, ((0, 0), (0, c_pad - cout))).astype(jnp.bfloat16)
    if bias is None:
        bv = jnp.zeros((1, c_pad), jnp.float32)
    else:
        bv = jnp.pad(bias.astype(jnp.float32), (0, c_pad - cout)).reshape(1, c_pad)
    return wm, bv


def init_params(key, input_nc, ndf=64, n_layers=3):
    """Deterministic parameters matching NLayerDiscriminator's layer shapes
    (default norm_layer=nn.BatchNorm2d -> use_bias=False for BN convs)."""
    layers = []

    def conv_w(k, cout, cin):
        return 0.02 * jax.random.normal(k, (cout, cin, KW, KW), jnp.float32)

    def add(w, b, stride, bn, act):
        wm, bv = _prepack_weight(w, b)
        layers.append(dict(w=w, b=b, w_mat=wm, b_vec=bv, cout=w.shape[0],
                           stride=stride, bn=bn, act=act))

    keys = jax.random.split(key, 3 * (n_layers + 2))
    ki = 0

    # first conv: bias, no norm, LeakyReLU
    add(conv_w(keys[ki], ndf, input_nc),
        0.02 * jax.random.normal(keys[ki + 1], (ndf,), jnp.float32), 2, None, True)
    ki += 2

    nf_mult = 1
    for nlyr in range(1, n_layers):
        nf_prev, nf_mult = nf_mult, min(2 ** nlyr, 8)
        g = 1.0 + 0.02 * jax.random.normal(keys[ki + 1], (ndf * nf_mult,), jnp.float32)
        b = 0.02 * jax.random.normal(keys[ki + 2], (ndf * nf_mult,), jnp.float32)
        add(conv_w(keys[ki], ndf * nf_mult, ndf * nf_prev), None, 2, (g, b), True)
        ki += 3

    nf_prev, nf_mult = nf_mult, min(2 ** n_layers, 8)
    g = 1.0 + 0.02 * jax.random.normal(keys[ki + 1], (ndf * nf_mult,), jnp.float32)
    b = 0.02 * jax.random.normal(keys[ki + 2], (ndf * nf_mult,), jnp.float32)
    add(conv_w(keys[ki], ndf * nf_mult, ndf * nf_prev), None, 1, (g, b), True)
    ki += 3

    # final 1-channel prediction map: bias, no norm, no activation
    add(conv_w(keys[ki], 1, ndf * nf_mult),
        0.02 * jax.random.normal(keys[ki + 1], (1,), jnp.float32), 1, None, False)
    return layers


def nlayer_discriminator_forward(x_nchw, layers):
    """Pallas forward. Input NCHW -> output NCHW (1-channel patch map)."""
    x = jnp.transpose(x_nchw.astype(jnp.float32), (0, 2, 3, 1))   # NHWC
    prenorm = None                                                # pending BN scale/shift
    last = len(layers) - 1
    for idx, lyr in enumerate(layers):
        out_dtype = jnp.float32 if idx == last else jnp.bfloat16
        with_stats = lyr["bn"] is not None
        y, stats, (n, ho, wo) = conv2d_pallas(
            x, prenorm, lyr["w_mat"], lyr["b_vec"], lyr["stride"],
            act=lyr["act"], with_stats=with_stats, out_dtype=out_dtype)
        m = n * ho * wo
        cout = lyr["cout"]
        if with_stats:
            gamma, beta = lyr["bn"]
            prenorm = _fold_bn(stats, m, gamma, beta, cout)        # applied by next layer
        else:
            prenorm = None
        x = y[:m, :cout].reshape(n, ho, wo, cout)                  # drop M / channel padding
    return jnp.transpose(x, (0, 3, 1, 2))                          # back to NCHW


# ----------------------------------------------------------------------------
# Pure-JAX reference (correctness check only)
# ----------------------------------------------------------------------------
def reference_forward(x_nchw, layers):
    def lrelu(v):
        return jnp.where(v >= 0, v, LEAKY_SLOPE * v)

    x = x_nchw.astype(jnp.float32)
    for lyr in layers:
        y = jax.lax.conv_general_dilated(
            x, lyr["w"], (lyr["stride"], lyr["stride"]),
            [(PADW, PADW), (PADW, PADW)],
            dimension_numbers=("NCHW", "OIHW", "NCHW"))
        if lyr["bn"] is None:
            if lyr["b"] is not None:
                y = y + lyr["b"].reshape(1, -1, 1, 1)
            if lyr["act"]:
                y = lrelu(y)
        else:
            gamma, beta = lyr["bn"]
            mean = jnp.mean(y, axis=(0, 2, 3), keepdims=True)
            var = jnp.mean((y - mean) ** 2, axis=(0, 2, 3), keepdims=True)
            y = (y - mean) * jax.lax.rsqrt(var + BN_EPS)
            y = y * gamma.reshape(1, -1, 1, 1) + beta.reshape(1, -1, 1, 1)
            y = lrelu(y)
        x = y
    return x


# ----------------------------------------------------------------------------
if __name__ == "__main__":
    key = jax.random.PRNGKey(0)
    k_x, k_p = jax.random.split(key)

    # small but valid shapes for n_layers=3 (spatial must survive 5 convs)
    batch, input_nc, hw = 2, 4, 32
    ndf, n_layers = 8, 3

    x = jax.random.normal(k_x, (batch, input_nc, hw, hw), jnp.float32)   # NCHW
    params = init_params(k_p, input_nc, ndf=ndf, n_layers=n_layers)

    fwd = jax.jit(functools.partial(nlayer_discriminator_forward, layers=params))
    out = jax.block_until_ready(fwd(x))
    ref = jax.block_until_ready(reference_forward(x, params))

    assert out.shape == ref.shape, (out.shape, ref.shape)
    max_err = float(jnp.max(jnp.abs(out - ref)))
    # bf16 patches / weights / intermediate slabs (f32 accumulation) vs f32 reference
    assert max_err < 5e-2, max_err

    print("KERNEL_OK")
</pallas_src>

<mosaic_0001>
module attributes {stable_mosaic.version = 11 : i64} {
  func.func @_conv_bias_act_kernel(%arg0: i32, %arg1: memref<256x64xbf16, #tpu.memory_space<vmem>>, %arg2: memref<64x128xbf16, #tpu.memory_space<vmem>>, %arg3: memref<1x128xf32, #tpu.memory_space<vmem>>, %arg4: memref<256x128xbf16, #tpu.memory_space<vmem>>) attributes {dimension_semantics = [#tpu.dimension_semantics<parallel>], iteration_bounds = array<i64: 2>, scalar_prefetch = 0 : i64, scratch_operands = 0 : i64, tpu.core_type = #tpu.core_type<tc>, window_params = [{transform_indices = @transform_0, window_bounds = array<i64: 256, 64>}, {pipeline_mode = #tpu.pipeline_mode<synchronous>, transform_indices = @transform_1, window_bounds = array<i64: 64, 128>}, {pipeline_mode = #tpu.pipeline_mode<synchronous>, transform_indices = @transform_2, window_bounds = array<i64: 1, 128>}, {transform_indices = @transform_3, window_bounds = array<i64: 256, 128>}]} {
    %c0 = arith.constant 0 : index
    %c0_0 = arith.constant 0 : index
    %0 = vector.load %arg1[%c0, %c0_0] : memref<256x64xbf16, #tpu.memory_space<vmem>>, vector<256x64xbf16>
    %c0_1 = arith.constant 0 : index
    %c0_2 = arith.constant 0 : index
    %1 = vector.load %arg2[%c0_1, %c0_2] : memref<64x128xbf16, #tpu.memory_space<vmem>>, vector<64x128xbf16>
    %cst = arith.constant dense<0.000000e+00> : vector<256x128xf32>
    %2 = tpu.matmul %0, %1, %cst {dimension_numbers = #tpu.dot_dimension_numbers<[1], [0], [0], [1], [0, 0, 1, 1], [], []>} : vector<256x64xbf16>, vector<64x128xbf16>, vector<256x128xf32> -> vector<256x128xf32>
    %c0_3 = arith.constant 0 : index
    %c0_4 = arith.constant 0 : index
    %3 = vector.load %arg3[%c0_3, %c0_4] : memref<1x128xf32, #tpu.memory_space<vmem>>, vector<1x128xf32>
    %4 = vector.broadcast %3 : vector<1x128xf32> to vector<256x128xf32>
    %5 = arith.addf %2, %4 : vector<256x128xf32>
    %cst_5 = arith.constant 0.000000e+00 : f32
    %6 = vector.broadcast %cst_5 : f32 to vector<256x128xf32>
    %7 = arith.cmpf oge, %5, %6 : vector<256x128xf32>
    %cst_6 = arith.constant 2.000000e-01 : f32
    %8 = vector.broadcast %cst_6 : f32 to vector<256x128xf32>
    %9 = arith.mulf %8, %5 : vector<256x128xf32>
    %10 = arith.select %7, %5, %9 : vector<256x128xi1>, vector<256x128xf32>
    %11 = arith.truncf %10 : vector<256x128xf32> to vector<256x128xbf16>
    %c0_7 = arith.constant 0 : index
    %c0_8 = arith.constant 0 : index
    %12 = vector.load %arg4[%c0_7, %c0_8] : memref<256x128xbf16, #tpu.memory_space<vmem>>, vector<256x128xbf16>
    tpu.vector_store %arg4[%c0_7, %c0_8], %11 {strides = array<i32>} : memref<256x128xbf16, #tpu.memory_space<vmem>>, vector<256x128xbf16>,
    return
  }
  func.func @transform_0(%arg0: i32) -> (i32, i32) {
    %c0_i32 = arith.constant 0 : i32
    %c0_i32_0 = arith.constant 0 : i32
    return %arg0, %c0_i32 : i32, i32
  }
  func.func @transform_1(%arg0: i32) -> (i32, i32) {
    %c0_i32 = arith.constant 0 : i32
    %c0_i32_0 = arith.constant 0 : i32
    %c0_i32_1 = arith.constant 0 : i32
    return %c0_i32, %c0_i32_0 : i32, i32
  }
  func.func @transform_2(%arg0: i32) -> (i32, i32) {
    %c0_i32 = arith.constant 0 : i32
    %c0_i32_0 = arith.constant 0 : i32
    %c0_i32_1 = arith.constant 0 : i32
    return %c0_i32, %c0_i32_0 : i32, i32
  }
  func.func @transform_3(%arg0: i32) -> (i32, i32) {
    %c0_i32 = arith.constant 0 : i32
    %c0_i32_0 = arith.constant 0 : i32
    return %arg0, %c0_i32 : i32, i32
  }
}

module attributes {stable_mosaic.version = 11 : i64} {
  func.func @_conv_bn_stats_kernel(%arg0: i32, %arg1: memref<64x128xbf16, #tpu.memory_space<vmem>>, %arg2: memref<128x128xbf16, #tpu.memory_space<vmem>>, %arg3: memref<64x128xbf16, #tpu.memory_space<vmem>>, %arg4: memref<8x128xf32, #tpu.memory_space<vmem>>) attributes {dimension_semantics = [#tpu.dimension_semantics<parallel>], iteration_bounds = array<i64: 2>, scalar_prefetch = 0 : i64, scratch_operands = 0 : i64, tpu.core_type = #tpu.core_type<tc>, window_params = [{transform_indices = @transform_0, window_bounds = array<i64: 64, 128>}, {pipeline_mode = #tpu.pipeline_mode<synchronous>, transform_indices = @transform_1, window_bounds = array<i64: 128, 128>}, {transform_indices = @transform_2, window_bounds = array<i64: 64, 128>}, {transform_indices = @transform_3, window_bounds = array<i64: 8, 128>}]} {
    %c0 = arith.constant 0 : index
    %c0_0 = arith.constant 0 : index
    %0 = vector.load %arg1[%c0, %c0_0] : memref<64x128xbf16, #tpu.memory_space<vmem>>, vector<64x128xbf16>
    %c0_1 = arith.constant 0 : index
    %c0_2 = arith.constant 0 : index
    %1 = vector.load %arg2[%c0_1, %c0_2] : memref<128x128xbf16, #tpu.memory_space<vmem>>, vector<128x128xbf16>
    %cst = arith.constant dense<0.000000e+00> : vector<64x128xf32>
    %2 = tpu.matmul %0, %1, %cst {dimension_numbers = #tpu.dot_dimension_numbers<[1], [0], [0], [1], [0, 0, 1, 1], [], []>} : vector<64x128xbf16>, vector<128x128xbf16>, vector<64x128xf32> -> vector<64x128xf32>
    %3 = arith.truncf %2 : vector<64x128xf32> to vector<64x128xbf16>
    %c0_3 = arith.constant 0 : index
    %c0_4 = arith.constant 0 : index
    %4 = vector.load %arg3[%c0_3, %c0_4] : memref<64x128xbf16, #tpu.memory_space<vmem>>, vector<64x128xbf16>
    tpu.vector_store %arg3[%c0_3, %c0_4], %3 {strides = array<i32>} : memref<64x128xbf16, #tpu.memory_space<vmem>>, vector<64x128xbf16>,
    %cst_5 = arith.constant dense<0.000000e+00> : vector<128xf32>
    %5 = vector.multi_reduction <add>, %2, %cst_5 [0] : vector<64x128xf32> to vector<128xf32>
    %6 = vector.shape_cast %5 : vector<128xf32> to vector<1x128xf32>
    %7 = arith.mulf %2, %2 : vector<64x128xf32>
    %cst_6 = arith.constant dense<0.000000e+00> : vector<128xf32>
    %8 = vector.multi_reduction <add>, %7, %cst_6 [0] : vector<64x128xf32> to vector<128xf32>
    %9 = vector.shape_cast %8 : vector<128xf32> to vector<1x128xf32>
    %10 = tpu.iota {dimensions = array<i32: 0>} : vector<8x128xi32>
    %c0_i32 = arith.constant 0 : i32
    %11 = vector.broadcast %c0_i32 : i32 to vector<8x128xi32>
    %12 = arith.cmpi eq, %10, %11 : vector<8x128xi32>
    %c1_i32 = arith.constant 1 : i32
    %13 = vector.broadcast %c1_i32 : i32 to vector<8x128xi32>
    %14 = arith.cmpi eq, %10, %13 : vector<8x128xi32>
    %cst_7 = arith.constant 0.000000e+00 : f32
    %15 = vector.shape_cast %9 : vector<1x128xf32> to vector<1x128xf32>
    %16 = vector.broadcast %15 : vector<1x128xf32> to vector<8x128xf32>
    %17 = vector.broadcast %cst_7 : f32 to vector<8x128xf32>
    %18 = arith.select %14, %16, %17 : vector<8x128xi1>, vector<8x128xf32>
    %19 = vector.shape_cast %6 : vector<1x128xf32> to vector<1x128xf32>
    %20 = vector.broadcast %19 : vector<1x128xf32> to vector<8x128xf32>
    %21 = arith.select %12, %20, %18 : vector<8x128xi1>, vector<8x128xf32>
    %c0_8 = arith.constant 0 : index
    %c0_9 = arith.constant 0 : index
    %22 = vector.load %arg4[%c0_8, %c0_9] : memref<8x128xf32, #tpu.memory_space<vmem>>, vector<8x128xf32>
    tpu.vector_store %arg4[%c0_8, %c0_9], %21 {strides = array<i32>} : memref<8x128xf32, #tpu.memory_space<vmem>>, vector<8x128xf32>,
    return
  }
  func.func @transform_0(%arg0: i32) -> (i32, i32) {
    %c0_i32 = arith.constant 0 : i32
    %c0_i32_0 = arith.constant 0 : i32
    return %arg0, %c0_i32 : i32, i32
  }
  func.func @transform_1(%arg0: i32) -> (i32, i32) {
    %c0_i32 = arith.constant 0 : i32
    %c0_i32_0 = arith.constant 0 : i32
    %c0_i32_1 = arith.constant 0 : i32
    return %c0_i32, %c0_i32_0 : i32, i32
  }
  func.func @transform_2(%arg0: i32) -> (i32, i32) {
    %c0_i32 = arith.constant 0 : i32
    %c0_i32_0 = arith.constant 0 : i32
    return %arg0, %c0_i32 : i32, i32
  }
  func.func @transform_3(%arg0: i32) -> (i32, i32) {
    %c0_i32 = arith.constant 0 : i32
    %c0_i32_0 = arith.constant 0 : i32
    return %arg0, %c0_i32 : i32, i32
  }
}

module attributes {stable_mosaic.version = 11 : i64} {
  func.func @_conv_bn_stats_kernel(%arg0: i32, %arg1: memref<16x256xbf16, #tpu.memory_space<vmem>>, %arg2: memref<256x128xbf16, #tpu.memory_space<vmem>>, %arg3: memref<16x128xbf16, #tpu.memory_space<vmem>>, %arg4: memref<8x128xf32, #tpu.memory_space<vmem>>) attributes {dimension_semantics = [#tpu.dimension_semantics<parallel>], iteration_bounds = array<i64: 2>, scalar_prefetch = 0 : i64, scratch_operands = 0 : i64, tpu.core_type = #tpu.core_type<tc>, window_params = [{transform_indices = @transform_0, window_bounds = array<i64: 16, 256>}, {pipeline_mode = #tpu.pipeline_mode<synchronous>, transform_indices = @transform_1, window_bounds = array<i64: 256, 128>}, {transform_indices = @transform_2, window_bounds = array<i64: 16, 128>}, {transform_indices = @transform_3, window_bounds = array<i64: 8, 128>}]} {
    %c0 = arith.constant 0 : index
    %c0_0 = arith.constant 0 : index
    %0 = vector.load %arg1[%c0, %c0_0] : memref<16x256xbf16, #tpu.memory_space<vmem>>, vector<16x256xbf16>
    %c0_1 = arith.constant 0 : index
    %c0_2 = arith.constant 0 : index
    %1 = vector.load %arg2[%c0_1, %c0_2] : memref<256x128xbf16, #tpu.memory_space<vmem>>, vector<256x128xbf16>
    %cst = arith.constant dense<0.000000e+00> : vector<16x128xf32>
    %2 = tpu.matmul %0, %1, %cst {dimension_numbers = #tpu.dot_dimension_numbers<[1], [0], [0], [1], [0, 0, 1, 1], [], []>} : vector<16x256xbf16>, vector<256x128xbf16>, vector<16x128xf32> -> vector<16x128xf32>
    %3 = arith.truncf %2 : vector<16x128xf32> to vector<16x128xbf16>
    %c0_3 = arith.constant 0 : index
    %c0_4 = arith.constant 0 : index
    %4 = vector.load %arg3[%c0_3, %c0_4] : memref<16x128xbf16, #tpu.memory_space<vmem>>, vector<16x128xbf16>
    tpu.vector_store %arg3[%c0_3, %c0_4], %3 {strides = array<i32>} : memref<16x128xbf16, #tpu.memory_space<vmem>>, vector<16x128xbf16>,
    %cst_5 = arith.constant dense<0.000000e+00> : vector<128xf32>
    %5 = vector.multi_reduction <add>, %2, %cst_5 [0] : vector<16x128xf32> to vector<128xf32>
    %6 = vector.shape_cast %5 : vector<128xf32> to vector<1x128xf32>
    %7 = arith.mulf %2, %2 : vector<16x128xf32>
    %cst_6 = arith.constant dense<0.000000e+00> : vector<128xf32>
    %8 = vector.multi_reduction <add>, %7, %cst_6 [0] : vector<16x128xf32> to vector<128xf32>
    %9 = vector.shape_cast %8 : vector<128xf32> to vector<1x128xf32>
    %10 = tpu.iota {dimensions = array<i32: 0>} : vector<8x128xi32>
    %c0_i32 = arith.constant 0 : i32
    %11 = vector.broadcast %c0_i32 : i32 to vector<8x128xi32>
    %12 = arith.cmpi eq, %10, %11 : vector<8x128xi32>
    %c1_i32 = arith.constant 1 : i32
    %13 = vector.broadcast %c1_i32 : i32 to vector<8x128xi32>
    %14 = arith.cmpi eq, %10, %13 : vector<8x128xi32>
    %cst_7 = arith.constant 0.000000e+00 : f32
    %15 = vector.shape_cast %9 : vector<1x128xf32> to vector<1x128xf32>
    %16 = vector.broadcast %15 : vector<1x128xf32> to vector<8x128xf32>
    %17 = vector.broadcast %cst_7 : f32 to vector<8x128xf32>
    %18 = arith.select %14, %16, %17 : vector<8x128xi1>, vector<8x128xf32>
    %19 = vector.shape_cast %6 : vector<1x128xf32> to vector<1x128xf32>
    %20 = vector.broadcast %19 : vector<1x128xf32> to vector<8x128xf32>
    %21 = arith.select %12, %20, %18 : vector<8x128xi1>, vector<8x128xf32>
    %c0_8 = arith.constant 0 : index
    %c0_9 = arith.constant 0 : index
    %22 = vector.load %arg4[%c0_8, %c0_9] : memref<8x128xf32, #tpu.memory_space<vmem>>, vector<8x128xf32>
    tpu.vector_store %arg4[%c0_8, %c0_9], %21 {strides = array<i32>} : memref<8x128xf32, #tpu.memory_space<vmem>>, vector<8x128xf32>,
    return
  }
  func.func @transform_0(%arg0: i32) -> (i32, i32) {
    %c0_i32 = arith.constant 0 : i32
    %c0_i32_0 = arith.constant 0 : i32
    return %arg0, %c0_i32 : i32, i32
  }
  func.func @transform_1(%arg0: i32) -> (i32, i32) {
    %c0_i32 = arith.constant 0 : i32
    %c0_i32_0 = arith.constant 0 : i32
    %c0_i32_1 = arith.constant 0 : i32
    return %c0_i32, %c0_i32_0 : i32, i32
  }
  func.func @transform_2(%arg0: i32) -> (i32, i32) {
    %c0_i32 = arith.constant 0 : i32
    %c0_i32_0 = arith.constant 0 : i32
    return %arg0, %c0_i32 : i32, i32
  }
  func.func @transform_3(%arg0: i32) -> (i32, i32) {
    %c0_i32 = arith.constant 0 : i32
    %c0_i32_0 = arith.constant 0 : i32
    return %arg0, %c0_i32 : i32, i32
  }
}

module attributes {stable_mosaic.version = 11 : i64} {
  func.func @_conv_bn_stats_kernel(%arg0: i32, %arg1: memref<16x512xbf16, #tpu.memory_space<vmem>>, %arg2: memref<512x128xbf16, #tpu.memory_space<vmem>>, %arg3: memref<16x128xbf16, #tpu.memory_space<vmem>>, %arg4: memref<8x128xf32, #tpu.memory_space<vmem>>) attributes {dimension_semantics = [#tpu.dimension_semantics<parallel>], iteration_bounds = array<i64: 2>, scalar_prefetch = 0 : i64, scratch_operands = 0 : i64, tpu.core_type = #tpu.core_type<tc>, window_params = [{transform_indices = @transform_0, window_bounds = array<i64: 16, 512>}, {pipeline_mode = #tpu.pipeline_mode<synchronous>, transform_indices = @transform_1, window_bounds = array<i64: 512, 128>}, {transform_indices = @transform_2, window_bounds = array<i64: 16, 128>}, {transform_indices = @transform_3, window_bounds = array<i64: 8, 128>}]} {
    %c0 = arith.constant 0 : index
    %c0_0 = arith.constant 0 : index
    %0 = vector.load %arg1[%c0, %c0_0] : memref<16x512xbf16, #tpu.memory_space<vmem>>, vector<16x512xbf16>
    %c0_1 = arith.constant 0 : index
    %c0_2 = arith.constant 0 : index
    %1 = vector.load %arg2[%c0_1, %c0_2] : memref<512x128xbf16, #tpu.memory_space<vmem>>, vector<512x128xbf16>
    %cst = arith.constant dense<0.000000e+00> : vector<16x128xf32>
    %2 = tpu.matmul %0, %1, %cst {dimension_numbers = #tpu.dot_dimension_numbers<[1], [0], [0], [1], [0, 0, 1, 1], [], []>} : vector<16x512xbf16>, vector<512x128xbf16>, vector<16x128xf32> -> vector<16x128xf32>
    %3 = arith.truncf %2 : vector<16x128xf32> to vector<16x128xbf16>
    %c0_3 = arith.constant 0 : index
    %c0_4 = arith.constant 0 : index
    %4 = vector.load %arg3[%c0_3, %c0_4] : memref<16x128xbf16, #tpu.memory_space<vmem>>, vector<16x128xbf16>
    tpu.vector_store %arg3[%c0_3, %c0_4], %3 {strides = array<i32>} : memref<16x128xbf16, #tpu.memory_space<vmem>>, vector<16x128xbf16>,
    %cst_5 = arith.constant dense<0.000000e+00> : vector<128xf32>
    %5 = vector.multi_reduction <add>, %2, %cst_5 [0] : vector<16x128xf32> to vector<128xf32>
    %6 = vector.shape_cast %5 : vector<128xf32> to vector<1x128xf32>
    %7 = arith.mulf %2, %2 : vector<16x128xf32>
    %cst_6 = arith.constant dense<0.000000e+00> : vector<128xf32>
    %8 = vector.multi_reduction <add>, %7, %cst_6 [0] : vector<16x128xf32> to vector<128xf32>
    %9 = vector.shape_cast %8 : vector<128xf32> to vector<1x128xf32>
    %10 = tpu.iota {dimensions = array<i32: 0>} : vector<8x128xi32>
    %c0_i32 = arith.constant 0 : i32
    %11 = vector.broadcast %c0_i32 : i32 to vector<8x128xi32>
    %12 = arith.cmpi eq, %10, %11 : vector<8x128xi32>
    %c1_i32 = arith.constant 1 : i32
    %13 = vector.broadcast %c1_i32 : i32 to vector<8x128xi32>
    %14 = arith.cmpi eq, %10, %13 : vector<8x128xi32>
    %cst_7 = arith.constant 0.000000e+00 : f32
    %15 = vector.shape_cast %9 : vector<1x128xf32> to vector<1x128xf32>
    %16 = vector.broadcast %15 : vector<1x128xf32> to vector<8x128xf32>
    %17 = vector.broadcast %cst_7 : f32 to vector<8x128xf32>
    %18 = arith.select %14, %16, %17 : vector<8x128xi1>, vector<8x128xf32>
    %19 = vector.shape_cast %6 : vector<1x128xf32> to vector<1x128xf32>
    %20 = vector.broadcast %19 : vector<1x128xf32> to vector<8x128xf32>
    %21 = arith.select %12, %20, %18 : vector<8x128xi1>, vector<8x128xf32>
    %c0_8 = arith.constant 0 : index
    %c0_9 = arith.constant 0 : index
    %22 = vector.load %arg4[%c0_8, %c0_9] : memref<8x128xf32, #tpu.memory_space<vmem>>, vector<8x128xf32>
    tpu.vector_store %arg4[%c0_8, %c0_9], %21 {strides = array<i32>} : memref<8x128xf32, #tpu.memory_space<vmem>>, vector<8x128xf32>,
    return
  }
  func.func @transform_0(%arg0: i32) -> (i32, i32) {
    %c0_i32 = arith.constant 0 : i32
    %c0_i32_0 = arith.constant 0 : i32
    return %arg0, %c0_i32 : i32, i32
  }
  func.func @transform_1(%arg0: i32) -> (i32, i32) {
    %c0_i32 = arith.constant 0 : i32
    %c0_i32_0 = arith.constant 0 : i32
    %c0_i32_1 = arith.constant 0 : i32
    return %c0_i32, %c0_i32_0 : i32, i32
  }
  func.func @transform_2(%arg0: i32) -> (i32, i32) {
    %c0_i32 = arith.constant 0 : i32
    %c0_i32_0 = arith.constant 0 : i32
    return %arg0, %c0_i32 : i32, i32
  }
  func.func @transform_3(%arg0: i32) -> (i32, i32) {
    %c0_i32 = arith.constant 0 : i32
    %c0_i32_0 = arith.constant 0 : i32
    return %arg0, %c0_i32 : i32, i32
  }
}

module attributes {stable_mosaic.version = 11 : i64} {
  func.func @_conv_bias_act_kernel(%arg0: i32, %arg1: memref<16x1024xbf16, #tpu.memory_space<vmem>>, %arg2: memref<1024x128xbf16, #tpu.memory_space<vmem>>, %arg3: memref<1x128xf32, #tpu.memory_space<vmem>>, %arg4: memref<16x128xf32, #tpu.memory_space<vmem>>) attributes {dimension_semantics = [#tpu.dimension_semantics<parallel>], iteration_bounds = array<i64: 1>, scalar_prefetch = 0 : i64, scratch_operands = 0 : i64, tpu.core_type = #tpu.core_type<tc>, window_params = [{transform_indices = @transform_0, window_bounds = array<i64: 16, 1024>}, {pipeline_mode = #tpu.pipeline_mode<synchronous>, transform_indices = @transform_1, window_bounds = array<i64: 1024, 128>}, {pipeline_mode = #tpu.pipeline_mode<synchronous>, transform_indices = @transform_2, window_bounds = array<i64: 1, 128>}, {transform_indices = @transform_3, window_bounds = array<i64: 16, 128>}]} {
    %c0 = arith.constant 0 : index
    %c0_0 = arith.constant 0 : index
    %0 = vector.load %arg1[%c0, %c0_0] : memref<16x1024xbf16, #tpu.memory_space<vmem>>, vector<16x1024xbf16>
    %c0_1 = arith.constant 0 : index
    %c0_2 = arith.constant 0 : index
    %1 = vector.load %arg2[%c0_1, %c0_2] : memref<1024x128xbf16, #tpu.memory_space<vmem>>, vector<1024x128xbf16>
    %cst = arith.constant dense<0.000000e+00> : vector<16x128xf32>
    %2 = tpu.matmul %0, %1, %cst {dimension_numbers = #tpu.dot_dimension_numbers<[1], [0], [0], [1], [0, 0, 1, 1], [], []>} : vector<16x1024xbf16>, vector<1024x128xbf16>, vector<16x128xf32> -> vector<16x128xf32>
    %c0_3 = arith.constant 0 : index
    %c0_4 = arith.constant 0 : index
    %3 = vector.load %arg3[%c0_3, %c0_4] : memref<1x128xf32, #tpu.memory_space<vmem>>, vector<1x128xf32>
    %4 = vector.broadcast %3 : vector<1x128xf32> to vector<16x128xf32>
    %5 = arith.addf %2, %4 : vector<16x128xf32>
    %c0_5 = arith.constant 0 : index
    %c0_6 = arith.constant 0 : index
    %6 = vector.load %arg4[%c0_5, %c0_6] : memref<16x128xf32, #tpu.memory_space<vmem>>, vector<16x128xf32>
    tpu.vector_store %arg4[%c0_5, %c0_6], %5 {strides = array<i32>} : memref<16x128xf32, #tpu.memory_space<vmem>>, vector<16x128xf32>,
    return
  }
  func.func @transform_0(%arg0: i32) -> (i32, i32) {
    %c0_i32 = arith.constant 0 : i32
    %c0_i32_0 = arith.constant 0 : i32
    return %arg0, %c0_i32 : i32, i32
  }
  func.func @transform_1(%arg0: i32) -> (i32, i32) {
    %c0_i32 = arith.constant 0 : i32
    %c0_i32_0 = arith.constant 0 : i32
    %c0_i32_1 = arith.constant 0 : i32
    return %c0_i32, %c0_i32_0 : i32, i32
  }
  func.func @transform_2(%arg0: i32) -> (i32, i32) {
    %c0_i32 = arith.constant 0 : i32
    %c0_i32_0 = arith.constant 0 : i32
    %c0_i32_1 = arith.constant 0 : i32
    return %c0_i32, %c0_i32_0 : i32, i32
  }
  func.func @transform_3(%arg0: i32) -> (i32, i32) {
    %c0_i32 = arith.constant 0 : i32
    %c0_i32_0 = arith.constant 0 : i32
    return %arg0, %c0_i32 : i32, i32
  }
}

</mosaic_0001>

<bundles_post_ra>
// kernel: nlayer_discriminator_forward.5
= control target key start
LH: loop header
LB: loop body
LE: loop exit
PB: predicated region body
PF: predicated region fallthrough
CT: control target
= control target key end

     0   :  { %s948_s12 = smov 0   ;;  %s1073_s0 = inlined_call_operand.vmem [shape: bf16[512,64], index: 0, kind: input, shape index: {}]   ;;  %s1074_s1 = inlined_call_operand.vmem [shape: bf16[64,128], index: 1, kind: input, shape index: {}]   ;;  %s1075_s2 = inlined_call_operand.vmem [shape: f32[1,128], index: 2, kind: input, shape index: {}]   ;;  %s1076_s3 = inlined_call_operand.vmem [shape: bf16[512,128], index: 3, kind: output, shape index: {}]  }
   0x1 LB: > { %s677_s13 = sadd.s32 4294967295, %s926_s12   ;;  %p681_p0 = scmp.ge.s32.totalorder %s926_s12, 1  ;;  %s926_s12 = sphi %s948_s12, %s13_s12  }
   0x2   : > { %p138_p1 = scmp.lt.s32.totalorder %s926_s12, 3 }
   0x4   : > { %p139_p2 = pnand %p681_p0, %p138_p1 }
   0x5   : > { %s682_s16 = sshll.u32 (!%p139_p2), %s677_s13, 5 }
   0x6   : > { %142 = sbr.rel (%p139_p2) target bundleno = 225 (0xe1), region = 32  ;;  %p163_p3 = scmp.lt.s32.totalorder (!%p139_p2), %s682_s16, 63 }
   0xb   : > { %v803_v0 = vld [vmem:[%s1074_s1 + $0x18] sm:$0xff]  ;;  %v802_v1 = vld [vmem:[%s1074_s1 + $0x10] sm:$0xff]  ;;  %s1078_s16 = smov (!%p163_p3, %s682_s16), 63  ;;  %v801_v2 = vld [vmem:[%s1074_s1 + $0x8] sm:$0xff]  ;;  %vm323_vm0 = vcmask 523264  }
   0xc   : > { %376 = vmatpush.bf16.msra.mxu0 %v803_v0  ;;  %899 = vmatpush.bf16.msra.mxu1 %v803_v0  ;;  %s683_s21 = sshll.u32 %s1078_s16, 2  ;;  %v800_v3 = vld [vmem:[%s1074_s1] sm:$0xff] }
   0xd   : > { %900 = vmatpush.bf16.msra.mxu2 %v803_v0  ;;  %901 = vmatpush.bf16.msra.mxu3 %v803_v0  ;;  %s976_s26 = scalar_lea.vmem %s1073_s0, %s683_s21  ;;  %v1013_v22 = vld [vmem:[%s1075_s2] ss:$0 sm:$0xff]  ;;  %s1026_s4 = scalar_lea.vmem %s1076_s3, %s683_s21 }
   0xe   : > { %v784_v4 = vld [vmem:[%s976_s26] sm:$0xff]  ;;  %v785_v8 = vld [vmem:[%s976_s26 + $0x8] sm:$0xff]  ;;  %v786_v12 = vld [vmem:[%s976_s26 + $0x10] sm:$0xff] }
   0xf   : > { %v788_v5 = vld [vmem:[%s976_s26 + $0x20] sm:$0xff]  ;;  %v789_v9 = vld [vmem:[%s976_s26 + $0x28] sm:$0xff]  ;;  %v790_v13 = vld [vmem:[%s976_s26 + $0x30] sm:$0xff] }
  0x10   : > { %377 = vmatpush.bf16.msra.mxu0 %v802_v1  ;;  %902 = vmatpush.bf16.msra.mxu1 %v802_v1  ;;  %v792_v6 = vld [vmem:[%s976_s26 + $0x40] sm:$0xff]  ;;  %v793_v10 = vld [vmem:[%s976_s26 + $0x48] sm:$0xff]  ;;  %v794_v14 = vld [vmem:[%s976_s26 + $0x50] sm:$0xff] }
  0x11   : > { %903 = vmatpush.bf16.msra.mxu2 %v802_v1  ;;  %904 = vmatpush.bf16.msra.mxu3 %v802_v1  ;;  %v796_v7 = vld [vmem:[%s976_s26 + $0x60] sm:$0xff]  ;;  %v797_v11 = vld [vmem:[%s976_s26 + $0x68] sm:$0xff]  ;;  %v798_v15 = vld [vmem:[%s976_s26 + $0x70] sm:$0xff] }
  0x12   : > { %v787_v16 = vld [vmem:[%s976_s26 + $0x18] sm:$0xff] }
  0x13   : > { %v791_v17 = vld [vmem:[%s976_s26 + $0x38] sm:$0xff] }
  0x14   : > { %378 = vmatpush.bf16.msra.mxu0 %v801_v2  ;;  %905 = vmatpush.bf16.msra.mxu1 %v801_v2  ;;  %v795_v18 = vld [vmem:[%s976_s26 + $0x58] sm:$0xff] }
  0x15   : > { %906 = vmatpush.bf16.msra.mxu2 %v801_v2  ;;  %907 = vmatpush.bf16.msra.mxu3 %v801_v2  ;;  %v799_v19 = vld [vmem:[%s976_s26 + $0x78] sm:$0xff] }
  0x18   : > { %379 = vmatpush.bf16.msra.mxu0 %v800_v3  ;;  %908 = vmatpush.bf16.msra.mxu1 %v800_v3 }
  0x19   : > { %909 = vmatpush.bf16.msra.mxu2 %v800_v3  ;;  %910 = vmatpush.bf16.msra.mxu3 %v800_v3 }
  0x1b   : > { %766 = vmatmul.msk.bf16.vlgmr.msra.gmra.mxu0 %vm323_vm0, %v784_v4  ;;  %770 = vmatmul.msk.bf16.vlgmr.msra.gmra.mxu1 %vm323_vm0, %v788_v5 }
  0x1c   : > { %774 = vmatmul.msk.bf16.vlgmr.msra.gmra.mxu2 %vm323_vm0, %v792_v6  ;;  %778 = vmatmul.msk.bf16.vlgmr.msra.gmra.mxu3 %vm323_vm0, %v796_v7 }
  0x2b   : > { %767 = vmatmul.msk.bf16.gmra.mxu0 %vm323_vm0, %v785_v8  ;;  %771 = vmatmul.msk.bf16.gmra.mxu1 %vm323_vm0, %v789_v9 }
  0x2c   : > { %775 = vmatmul.msk.bf16.gmra.mxu2 %vm323_vm0, %v793_v10  ;;  %779 = vmatmul.msk.bf16.gmra.mxu3 %vm323_vm0, %v797_v11 }
  0x3b   : > { %768 = vmatmul.msk.bf16.gmra.mxu0 %vm323_vm0, %v786_v12  ;;  %772 = vmatmul.msk.bf16.gmra.mxu1 %vm323_vm0, %v790_v13 }
  0x3c   : > { %776 = vmatmul.msk.bf16.gmra.mxu2 %vm323_vm0, %v794_v14  ;;  %780 = vmatmul.msk.bf16.gmra.mxu3 %vm323_vm0, %v798_v15 }
  0x4b   : > { %769 = vmatmul.msk.bf16.gmra.mxu0 %vm323_vm0, %v787_v16  ;;  %773 = vmatmul.msk.bf16.gmra.mxu1 %vm323_vm0, %v791_v17 }
  0x4c   : > { %777 = vmatmul.msk.bf16.gmra.mxu2 %vm323_vm0, %v795_v18  ;;  %781 = vmatmul.msk.bf16.gmra.mxu3 %vm323_vm0, %v799_v19 }
  0x98   : > { %v381_v20 = vpop.f32.mrf.mxu0  ;;  %v401_v21 = vpop.f32.mrf.mxu1 }
  0x99   : > { %v382_v23 = vadd.f32 %v1013_v22, %v381_v20  ;;  %v402_v24 = vadd.f32 %v1013_v22, %v401_v21 }
  0x9b   : > { %v493_v29 = vmul.f32 0.2, %v382_v23  ;;  %v501_v30 = vmul.f32 0.2, %v402_v24  ;;  %vm461_vm1 = vcmp.ge.f32.partialorder %v382_v23, 0.0  ;;  %vm469_vm2 = vcmp.ge.f32.partialorder %v402_v24, 0.0 }
  0x9d   : > { %v525_v37 = vsel %vm461_vm1, %v382_v23, %v493_v29  ;;  %v533_v38 = vsel %vm469_vm2, %v402_v24, %v501_v30 }
  0x9f   : > { %v421_v25 = vpop.f32.mrf.mxu2  ;;  %v441_v26 = vpop.f32.mrf.mxu3 }
  0xa0   : > { %v383_v27 = vpop.f32.mrf.mxu0  ;;  %v403_v28 = vpop.f32.mrf.mxu1  ;;  %v422_v35 = vadd.f32 %v1013_v22, %v421_v25  ;;  %v442_v36 = vadd.f32 %v1013_v22, %v441_v26 }
  0xa1   : > { %v384_v31 = vadd.f32 %v1013_v22, %v383_v27  ;;  %v404_v32 = vadd.f32 %v1013_v22, %v403_v28 }
  0xa2   : > { %v509_v45 = vmul.f32 0.2, %v422_v35  ;;  %v517_v46 = vmul.f32 0.2, %v442_v36  ;;  %vm477_vm5 = vcmp.ge.f32.partialorder %v422_v35, 0.0  ;;  %vm485_vm6 = vcmp.ge.f32.partialorder %v442_v36, 0.0 }
  0xa3   : > { %vm462_vm3 = vcmp.ge.f32.partialorder %v384_v31, 0.0  ;;  %v494_v33 = vmul.f32 0.2, %v384_v31  ;;  %vm470_vm4 = vcmp.ge.f32.partialorder %v404_v32, 0.0  ;;  %v502_v34 = vmul.f32 0.2, %v404_v32 }
  0xa4   : > { %v541_v53 = vsel %vm477_vm5, %v422_v35, %v509_v45  ;;  %v549_v54 = vsel %vm485_vm6, %v442_v36, %v517_v46 }
  0xa5   : > { %v526_v39 = vsel %vm462_vm3, %v384_v31, %v494_v33  ;;  %v534_v40 = vsel %vm470_vm4, %v404_v32, %v502_v34 }
  0xa6   : > { %v807_v41 = vpack.c.bf16 %v526_v39, %v525_v37  ;;  %v827_v42 = vpack.c.bf16 %v534_v40, %v533_v38 }
  0xa7   : > { %v423_v43 = vpop.f32.mrf.mxu2  ;;  %v443_v44 = vpop.f32.mrf.mxu3 }
  0xa8   : > { %808 = vst [vmem:[%s1026_s4] sm:$0xff] %v807_v41   ;;  %v424_v47 = vadd.f32 %v1013_v22, %v423_v43  ;;  %v444_v48 = vadd.f32 %v1013_v22, %v443_v44  ;;  %v386_v49 = vpop.f32.mrf.mxu0  ;;  %v406_v50 = vpop.f32.mrf.mxu1 }
  0xa9   : > { %887 = vst [vmem:[%s1026_s4 + $0x20] sm:$0xff] %v827_v42   ;;  %v387_v59 = vadd.f32 %v1013_v22, %v386_v49  ;;  %v407_v60 = vadd.f32 %v1013_v22, %v406_v50 }
  0xaa   : > { %vm478_vm7 = vcmp.ge.f32.partialorder %v424_v47, 0.0  ;;  %v510_v51 = vmul.f32 0.2, %v424_v47  ;;  %vm486_vm8 = vcmp.ge.f32.partialorder %v444_v48, 0.0  ;;  %v518_v52 = vmul.f32 0.2, %v444_v48 }
  0xab   : > { %v495_v1 = vmul.f32 0.2, %v387_v59  ;;  %v503_v2 = vmul.f32 0.2, %v407_v60  ;;  %vm463_vm9 = vcmp.ge.f32.partialorder %v387_v59, 0.0  ;;  %vm471_vm10 = vcmp.ge.f32.partialorder %v407_v60, 0.0 }
  0xac   : > { %v542_v55 = vsel %vm478_vm7, %v424_v47, %v510_v51  ;;  %v550_v56 = vsel %vm486_vm8, %v444_v48, %v518_v52 }
  0xad   : > { %v847_v57 = vpack.c.bf16 %v542_v55, %v541_v53  ;;  %v867_v58 = vpack.c.bf16 %v550_v56, %v549_v54  ;;  %v527_v9 = vsel %vm463_vm9, %v387_v59, %v495_v1  ;;  %v535_v10 = vsel %vm471_vm10, %v407_v60, %v503_v2 }
  0xaf   : > { %891 = vst [vmem:[%s1026_s4 + $0x40] sm:$0xff] %v847_v57   ;;  %v426_v61 = vpop.f32.mrf.mxu2  ;;  %v446_v62 = vpop.f32.mrf.mxu3 }
  0xb0   : > { %895 = vst [vmem:[%s1026_s4 + $0x60] sm:$0xff] %v867_v58   ;;  %v388_v63 = vpop.f32.mrf.mxu0  ;;  %v408_v0 = vpop.f32.mrf.mxu1  ;;  %v427_v7 = vadd.f32 %v1013_v22, %v426_v61  ;;  %v447_v8 = vadd.f32 %v1013_v22, %v446_v62 }
  0xb1   : > { %v389_v3 = vadd.f32 %v1013_v22, %v388_v63  ;;  %v409_v4 = vadd.f32 %v1013_v22, %v408_v0 }
  0xb2   : > { %v511_v17 = vmul.f32 0.2, %v427_v7  ;;  %v519_v18 = vmul.f32 0.2, %v447_v8  ;;  %vm479_vm13 = vcmp.ge.f32.partialorder %v427_v7, 0.0  ;;  %vm487_vm14 = vcmp.ge.f32.partialorder %v447_v8, 0.0 }
  0xb3   : > { %vm464_vm11 = vcmp.ge.f32.partialorder %v389_v3, 0.0  ;;  %v496_v5 = vmul.f32 0.2, %v389_v3  ;;  %vm472_vm12 = vcmp.ge.f32.partialorder %v409_v4, 0.0  ;;  %v504_v6 = vmul.f32 0.2, %v409_v4 }
  0xb4   : > { %v543_v26 = vsel %vm479_vm13, %v427_v7, %v511_v17  ;;  %v551_v27 = vsel %vm487_vm14, %v447_v8, %v519_v18 }
  0xb5   : > { %v528_v11 = vsel %vm464_vm11, %v389_v3, %v496_v5  ;;  %v536_v12 = vsel %vm472_vm12, %v409_v4, %v504_v6 }
  0xb6   : > { %v812_v13 = vpack.c.bf16 %v528_v11, %v527_v9  ;;  %v832_v14 = vpack.c.bf16 %v536_v12, %v535_v10 }
  0xb7   : > { %v428_v15 = vpop.f32.mrf.mxu2  ;;  %v448_v16 = vpop.f32.mrf.mxu3 }
  0xb8   : > { %884 = vst [vmem:[%s1026_s4 + $0x8] sm:$0xff] %v812_v13   ;;  %v429_v19 = vadd.f32 %v1013_v22, %v428_v15  ;;  %v449_v20 = vadd.f32 %v1013_v22, %v448_v16  ;;  %v391_v21 = vpop.f32.mrf.mxu0  ;;  %v411_v23 = vpop.f32.mrf.mxu1 }
  0xb9   : > { %888 = vst [vmem:[%s1026_s4 + $0x28] sm:$0xff] %v832_v14   ;;  %v392_v32 = vadd.f32 %v1013_v22, %v391_v21  ;;  %v412_v33 = vadd.f32 %v1013_v22, %v411_v23 }
  0xba   : > { %vm480_vm15 = vcmp.ge.f32.partialorder %v429_v19, 0.0  ;;  %v512_v24 = vmul.f32 0.2, %v429_v19  ;;  %vm488_vm0 = vcmp.ge.f32.partialorder %v449_v20, 0.0  ;;  %v520_v25 = vmul.f32 0.2, %v449_v20 }
  0xbb   : > { %v497_v38 = vmul.f32 0.2, %v392_v32  ;;  %v505_v39 = vmul.f32 0.2, %v412_v33  ;;  %vm465_vm1 = vcmp.ge.f32.partialorder %v392_v32, 0.0  ;;  %vm473_vm2 = vcmp.ge.f32.partialorder %v412_v33, 0.0 }
  0xbc   : > { %v544_v28 = vsel %vm480_vm15, %v429_v19, %v512_v24  ;;  %v552_v29 = vsel %vm488_vm0, %v449_v20, %v520_v25 }
  0xbd   : > { %v852_v30 = vpack.c.bf16 %v544_v28, %v543_v26  ;;  %v872_v31 = vpack.c.bf16 %v552_v29, %v551_v27  ;;  %v529_v46 = vsel %vm465_vm1, %v392_v32, %v497_v38  ;;  %v537_v47 = vsel %vm473_vm2, %v412_v33, %v505_v39 }
  0xbf   : > { %892 = vst [vmem:[%s1026_s4 + $0x48] sm:$0xff] %v852_v30   ;;  %v431_v34 = vpop.f32.mrf.mxu2  ;;  %v451_v35 = vpop.f32.mrf.mxu3 }
  0xc0   : > { %896 = vst [vmem:[%s1026_s4 + $0x68] sm:$0xff] %v872_v31   ;;  %v393_v36 = vpop.f32.mrf.mxu0  ;;  %v413_v37 = vpop.f32.mrf.mxu1  ;;  %v432_v44 = vadd.f32 %v1013_v22, %v431_v34  ;;  %v452_v45 = vadd.f32 %v1013_v22, %v451_v35 }
  0xc1   : > { %v394_v40 = vadd.f32 %v1013_v22, %v393_v36  ;;  %v414_v41 = vadd.f32 %v1013_v22, %v413_v37 }
  0xc2   : > { %v513_v54 = vmul.f32 0.2, %v432_v44  ;;  %v521_v55 = vmul.f32 0.2, %v452_v45  ;;  %vm481_vm5 = vcmp.ge.f32.partialorder %v432_v44, 0.0  ;;  %vm489_vm6 = vcmp.ge.f32.partialorder %v452_v45, 0.0 }
  0xc3   : > { %vm466_vm3 = vcmp.ge.f32.partialorder %v394_v40, 0.0  ;;  %v498_v42 = vmul.f32 0.2, %v394_v40  ;;  %vm474_vm4 = vcmp.ge.f32.partialorder %v414_v41, 0.0  ;;  %v506_v43 = vmul.f32 0.2, %v414_v41 }
  0xc4   : > { %v545_v62 = vsel %vm481_vm5, %v432_v44, %v513_v54  ;;  %v553_v63 = vsel %vm489_vm6, %v452_v45, %v521_v55 }
  0xc5   : > { %v530_v48 = vsel %vm466_vm3, %v394_v40, %v498_v42  ;;  %v538_v49 = vsel %vm474_vm4, %v414_v41, %v506_v43 }
  0xc6   : > { %v817_v50 = vpack.c.bf16 %v530_v48, %v529_v46  ;;  %v837_v51 = vpack.c.bf16 %v538_v49, %v537_v47 }
  0xc7   : > { %v433_v52 = vpop.f32.mrf.mxu2  ;;  %v453_v53 = vpop.f32.mrf.mxu3 }
  0xc8   : > { %885 = vst [vmem:[%s1026_s4 + $0x10] sm:$0xff] %v817_v50   ;;  %v434_v56 = vadd.f32 %v1013_v22, %v433_v52  ;;  %v454_v57 = vadd.f32 %v1013_v22, %v453_v53  ;;  %v396_v58 = vpop.f32.mrf.mxu0  ;;  %v416_v59 = vpop.f32.mrf.mxu1 }
  0xc9   : > { %889 = vst [vmem:[%s1026_s4 + $0x30] sm:$0xff] %v837_v51   ;;  %v397_v4 = vadd.f32 %v1013_v22, %v396_v58  ;;  %v417_v5 = vadd.f32 %v1013_v22, %v416_v59 }
  0xca   : > { %vm482_vm7 = vcmp.ge.f32.partialorder %v434_v56, 0.0  ;;  %v514_v60 = vmul.f32 0.2, %v434_v56  ;;  %vm490_vm8 = vcmp.ge.f32.partialorder %v454_v57, 0.0  ;;  %v522_v61 = vmul.f32 0.2, %v454_v57 }
  0xcb   : > { %v499_v10 = vmul.f32 0.2, %v397_v4  ;;  %v507_v11 = vmul.f32 0.2, %v417_v5  ;;  %vm467_vm9 = vcmp.ge.f32.partialorder %v397_v4, 0.0  ;;  %vm475_vm10 = vcmp.ge.f32.partialorder %v417_v5, 0.0 }
  0xcc   : > { %v546_v0 = vsel %vm482_vm7, %v434_v56, %v514_v60  ;;  %v554_v1 = vsel %vm490_vm8, %v454_v57, %v522_v61 }
  0xcd   : > { %v857_v2 = vpack.c.bf16 %v546_v0, %v545_v62  ;;  %v877_v3 = vpack.c.bf16 %v554_v1, %v553_v63  ;;  %v531_v18 = vsel %vm467_vm9, %v397_v4, %v499_v10  ;;  %v539_v19 = vsel %vm475_vm10, %v417_v5, %v507_v11 }
  0xcf   : > { %893 = vst [vmem:[%s1026_s4 + $0x50] sm:$0xff] %v857_v2   ;;  %v436_v6 = vpop.f32.mrf.mxu2  ;;  %v456_v7 = vpop.f32.mrf.mxu3 }
  0xd0   : > { %897 = vst [vmem:[%s1026_s4 + $0x70] sm:$0xff] %v877_v3   ;;  %v398_v8 = vpop.f32.mrf.mxu0  ;;  %v418_v9 = vpop.f32.mrf.mxu1  ;;  %v437_v16 = vadd.f32 %v1013_v22, %v436_v6  ;;  %v457_v17 = vadd.f32 %v1013_v22, %v456_v7 }
  0xd1   : > { %v399_v12 = vadd.f32 %v1013_v22, %v398_v8  ;;  %v419_v13 = vadd.f32 %v1013_v22, %v418_v9 }
  0xd2   : > { %v515_v27 = vmul.f32 0.2, %v437_v16  ;;  %v523_v28 = vmul.f32 0.2, %v457_v17  ;;  %vm483_vm13 = vcmp.ge.f32.partialorder %v437_v16, 0.0  ;;  %vm491_vm14 = vcmp.ge.f32.partialorder %v457_v17, 0.0 }
  0xd3   : > { %vm468_vm11 = vcmp.ge.f32.partialorder %v399_v12, 0.0  ;;  %v500_v14 = vmul.f32 0.2, %v399_v12  ;;  %vm476_vm12 = vcmp.ge.f32.partialorder %v419_v13, 0.0  ;;  %v508_v15 = vmul.f32 0.2, %v419_v13 }
  0xd4   : > { %v547_v33 = vsel %vm483_vm13, %v437_v16, %v515_v27  ;;  %v555_v34 = vsel %vm491_vm14, %v457_v17, %v523_v28 }
  0xd5   : > { %v532_v20 = vsel %vm468_vm11, %v399_v12, %v500_v14  ;;  %v540_v21 = vsel %vm476_vm12, %v419_v13, %v508_v15 }
  0xd6   : > { %v822_v23 = vpack.c.bf16 %v532_v20, %v531_v18  ;;  %v842_v24 = vpack.c.bf16 %v540_v21, %v539_v19 }
  0xd7   : > { %v438_v25 = vpop.f32.mrf.mxu2  ;;  %v458_v26 = vpop.f32.mrf.mxu3 }
  0xd8   : > { %886 = vst [vmem:[%s1026_s4 + $0x18] sm:$0xff] %v822_v23   ;;  %v439_v29 = vadd.f32 %v1013_v22, %v438_v25  ;;  %v459_v30 = vadd.f32 %v1013_v22, %v458_v26 }
  0xd9   : > { %890 = vst [vmem:[%s1026_s4 + $0x38] sm:$0xff] %v842_v24  }
  0xda   : > { %vm484_vm15 = vcmp.ge.f32.partialorder %v439_v29, 0.0  ;;  %v516_v31 = vmul.f32 0.2, %v439_v29  ;;  %vm492_vm0 = vcmp.ge.f32.partialorder %v459_v30, 0.0  ;;  %v524_v32 = vmul.f32 0.2, %v459_v30 }
  0xdc   : > { %v548_v35 = vsel %vm484_vm15, %v439_v29, %v516_v31  ;;  %v556_v36 = vsel %vm492_vm0, %v459_v30, %v524_v32 }
  0xdd   : > { %v862_v37 = vpack.c.bf16 %v548_v35, %v547_v33  ;;  %v882_v38 = vpack.c.bf16 %v556_v36, %v555_v34 }
  0xdf   : > { %894 = vst [vmem:[%s1026_s4 + $0x58] sm:$0xff] %v862_v37  }
  0xe0   : > { %898 = vst [vmem:[%s1026_s4 + $0x78] sm:$0xff] %v882_v38  }
  0xe1 PF: > { %s13_s12 = sadd.s32 1, %s926_s12  }
  0xe2   : > { %p10_p4 = scmp.ge.s32.totalorder %s13_s12, 4  }
  0xe4   :  { %12 = sbr.rel (!%p10_p4) target bundleno = 1 (0x1), region = 62 }

// kernel: nlayer_discriminator_forward.6
= control target key start
LH: loop header
LB: loop body
LE: loop exit
PB: predicated region body
PF: predicated region fallthrough
CT: control target
= control target key end

     0   :  { %s609_s12 = smov 0   ;;  %s661_s0 = inlined_call_operand.vmem [shape: bf16[128,128], index: 0, kind: input, shape index: {}]   ;;  %s662_s1 = inlined_call_operand.vmem [shape: bf16[128,128], index: 1, kind: input, shape index: {}]   ;;  %s663_s2 = inlined_call_operand.vmem [shape: bf16[128,128], index: 2, kind: output, shape index: {0}]   ;;  %s664_s3 = inlined_call_operand.vmem [shape: f32[16,128], index: 3, kind: output, shape index: {1}]  }
   0x1 LB: > { %s615_s13 = sadd.s32 4294967295, %s587_s12   ;;  %p458_p0 = scmp.ge.s32.totalorder %s587_s12, 1  ;;  %s587_s12 = sphi %s609_s12, %s14_s12  }
   0x2   : > { %p141_p1 = scmp.lt.s32.totalorder %s587_s12, 3 }
   0x4   : > { %p142_p2 = pnand %p458_p0, %p141_p1 }
   0x5   : > { %s459_s22 = sshll.u32 (!%p142_p2), %s615_s13, 3  ;;  %p181_p4 = scmp.lt.s32.totalorder (!%p142_p2), %s615_s13, 1 }
   0x6   : > { %145 = sbr.rel (%p142_p2) target bundleno = 208 (0xd0), region = 28  ;;  %p170_p3 = scmp.lt.s32.totalorder (!%p142_p2), %s459_s22, 15 }
   0xb   : > { %v525_v0 = vld [vmem:[%s662_s1 + $0x38] sm:$0xff]  ;;  %v524_v1 = vld [vmem:[%s662_s1 + $0x30] sm:$0xff]  ;;  %v523_v2 = vld [vmem:[%s662_s1 + $0x28] sm:$0xff]  ;;  %s666_s22 = smov (!%p170_p3, %s459_s22), 15  ;;  %v360_v49 = vlaneseq  ;;  %s668_s13 = smov (!%p181_p4, %s615_s13), 1 }
   0xc   : > { %281 = vmatpush.bf16.msra.mxu0 %v525_v0  ;;  %549 = vmatpush.bf16.msra.mxu1 %v525_v0  ;;  %v522_v3 = vld [vmem:[%s662_s1 + $0x20] sm:$0xff]  ;;  %v521_v4 = vld [vmem:[%s662_s1 + $0x18] sm:$0xff]  ;;  %v520_v5 = vld [vmem:[%s662_s1 + $0x10] sm:$0xff]  ;;  %s460_s29 = sshll.u32 %s666_s22, 2  ;;  %s463_s11 = sshll.u32 %s668_s13, 3 }
   0xd   : > { %550 = vmatpush.bf16.msra.mxu2 %v525_v0  ;;  %551 = vmatpush.bf16.msra.mxu3 %v525_v0  ;;  %v519_v6 = vld [vmem:[%s662_s1 + $0x8] sm:$0xff]  ;;  %v518_v7 = vld [vmem:[%s662_s1] sm:$0xff]  ;;  %s173_s7 = scalar_lea.vmem %s661_s0, %s460_s29  ;;  %s179_s10 = scalar_lea.vmem %s663_s2, %s460_s29  ;;  %v361_v54 = vshrl.u32 %v360_v49, 7 }
   0xe   : > { %v514_v8 = vld [vmem:[%s173_s7] sm:$0xff]  ;;  %v515_v9 = vld [vmem:[%s173_s7 + $0x8] sm:$0xff]  ;;  %v516_v10 = vld [vmem:[%s173_s7 + $0x10] sm:$0xff]  ;;  %s184_s16 = scalar_lea.vmem %s664_s3, %s463_s11 }
   0xf   : > { %v517_v11 = vld [vmem:[%s173_s7 + $0x18] sm:$0xff]  ;;  %vm363_vm0 = vcmp.eq.s32.totalorder %v361_v54, 1  ;;  %vm362_vm1 = vcmp.eq.s32.totalorder %v361_v54, 0 }
  0x10   : > { %282 = vmatpush.bf16.msra.mxu0 %v524_v1  ;;  %552 = vmatpush.bf16.msra.mxu1 %v524_v1 }
  0x11   : > { %553 = vmatpush.bf16.msra.mxu2 %v524_v1  ;;  %554 = vmatpush.bf16.msra.mxu3 %v524_v1 }
  0x14   : > { %283 = vmatpush.bf16.msra.mxu0 %v523_v2  ;;  %555 = vmatpush.bf16.msra.mxu1 %v523_v2 }
  0x15   : > { %556 = vmatpush.bf16.msra.mxu2 %v523_v2  ;;  %557 = vmatpush.bf16.msra.mxu3 %v523_v2 }
  0x18   : > { %284 = vmatpush.bf16.msra.mxu0 %v522_v3  ;;  %558 = vmatpush.bf16.msra.mxu1 %v522_v3 }
  0x19   : > { %559 = vmatpush.bf16.msra.mxu2 %v522_v3  ;;  %560 = vmatpush.bf16.msra.mxu3 %v522_v3 }
  0x1c   : > { %285 = vmatpush.bf16.msra.mxu0 %v521_v4  ;;  %561 = vmatpush.bf16.msra.mxu1 %v521_v4 }
  0x1d   : > { %562 = vmatpush.bf16.msra.mxu2 %v521_v4  ;;  %563 = vmatpush.bf16.msra.mxu3 %v521_v4 }
  0x20   : > { %286 = vmatpush.bf16.msra.mxu0 %v520_v5  ;;  %564 = vmatpush.bf16.msra.mxu1 %v520_v5 }
  0x21   : > { %565 = vmatpush.bf16.msra.mxu2 %v520_v5  ;;  %566 = vmatpush.bf16.msra.mxu3 %v520_v5 }
  0x24   : > { %287 = vmatpush.bf16.msra.mxu0 %v519_v6  ;;  %567 = vmatpush.bf16.msra.mxu1 %v519_v6 }
  0x25   : > { %568 = vmatpush.bf16.msra.mxu2 %v519_v6  ;;  %569 = vmatpush.bf16.msra.mxu3 %v519_v6 }
  0x28   : > { %288 = vmatpush.bf16.msra.mxu0 %v518_v7  ;;  %570 = vmatpush.bf16.msra.mxu1 %v518_v7 }
  0x29   : > { %571 = vmatpush.bf16.msra.mxu2 %v518_v7  ;;  %572 = vmatpush.bf16.msra.mxu3 %v518_v7 }
  0x2b   : > { %289 = vmatmul.bf16.vlgmr.msra.gmra.mxu0 %v514_v8  ;;  %294 = vmatmul.bf16.vlgmr.msra.gmra.mxu1 %v515_v9 }
  0x2c   : > { %299 = vmatmul.bf16.vlgmr.msra.gmra.mxu2 %v516_v10  ;;  %304 = vmatmul.bf16.vlgmr.msra.gmra.mxu3 %v517_v11 }
  0xa8   : > { %v290_v12 = vpop.f32.mrf.mxu0  ;;  %v295_v13 = vpop.f32.mrf.mxu1 }
  0xa9   : > { %v339_v16 = vmul.f32 %v290_v12, %v290_v12  ;;  %v341_v23 = vmul.f32 %v295_v13, %v295_v13 }
  0xaf   : > { %v300_v14 = vpop.f32.mrf.mxu2  ;;  %v305_v15 = vpop.f32.mrf.mxu3 }
  0xb0   : > { %v292_v17 = vpop.f32.mrf.mxu0  ;;  %v297_v18 = vpop.f32.mrf.mxu1  ;;  %v343_v29 = vmul.f32 %v300_v14, %v300_v14  ;;  %v345_v39 = vmul.f32 %v305_v15, %v305_v15 }
  0xb1   : > { %v529_v19 = vpack.c.bf16 %v292_v17, %v290_v12  ;;  %v326_v20 = vadd.f32 %v292_v17, %v290_v12  ;;  %v340_v21 = vmul.f32 %v292_v17, %v292_v17  ;;  %v534_v22 = vpack.c.bf16 %v297_v18, %v295_v13 }
  0xb2   : > { %v342_v27 = vmul.f32 %v297_v18, %v297_v18 }
  0xb3   : > { %530 = vst [vmem:[%s179_s10] sm:$0xff] %v529_v19   ;;  %v347_v24 = vadd.f32 %v340_v21, %v339_v16  ;;  %v327_v25 = vadd.f32 %v326_v20, %v295_v13 }
  0xb4   : > { %546 = vst [vmem:[%s179_s10 + $0x8] sm:$0xff] %v534_v22  }
  0xb5   : > { %v328_v26 = vadd.f32 %v327_v25, %v297_v18  ;;  %v348_v28 = vadd.f32 %v347_v24, %v341_v23 }
  0xb7   : > { %v349_v30 = vadd.f32 %v348_v28, %v342_v27  ;;  %v302_v31 = vpop.f32.mrf.mxu2  ;;  %v329_v32 = vadd.f32 %v328_v26, %v300_v14  ;;  %v307_v33 = vpop.f32.mrf.mxu3 }
  0xb8   : > { %v539_v34 = vpack.c.bf16 %v302_v31, %v300_v14  ;;  %v544_v35 = vpack.c.bf16 %v307_v33, %v305_v15  ;;  %v344_v37 = vmul.f32 %v302_v31, %v302_v31  ;;  %v346_v43 = vmul.f32 %v307_v33, %v307_v33 }
  0xb9   : > { %v330_v36 = vadd.f32 %v329_v32, %v302_v31  ;;  %v350_v38 = vadd.f32 %v349_v30, %v343_v29 }
  0xba   : > { %547 = vst [vmem:[%s179_s10 + $0x10] sm:$0xff] %v539_v34  }
  0xbb   : > { %v351_v40 = vadd.f32 %v350_v38, %v344_v37  ;;  %548 = vst [vmem:[%s179_s10 + $0x18] sm:$0xff] %v544_v35   ;;  %v331_v41 = vadd.f32 %v330_v36, %v305_v15 }
  0xbd   : > { %v332_v42 = vadd.f32 %v331_v41, %v307_v33  ;;  %v352_v44 = vadd.f32 %v351_v40, %v345_v39 }
  0xbf   : > { %v333_v45 = vrot.slane %v332_v42, 4  ;;  %v353_v46 = vadd.f32 %v352_v44, %v346_v43 }
  0xc1   : > { %v334_v47 = vadd.f32 %v333_v45, %v332_v42  ;;  %v354_v48 = vrot.slane %v353_v46, 4 }
  0xc3   : > { %v335_v50 = vrot.slane %v334_v47, 2  ;;  %v355_v51 = vadd.f32 %v354_v48, %v353_v46 }
  0xc5   : > { %v336_v52 = vadd.f32 %v335_v50, %v334_v47  ;;  %v356_v53 = vrot.slane %v355_v51, 2 }
  0xc7   : > { %v357_v55 = vadd.f32 %v356_v53, %v355_v51  ;;  %v337_v56 = vrot.slane %v336_v52, 1 }
  0xc9   : > { %v358_v57 = vrot.slane %v357_v55, 1  ;;  %v338_v59 = vadd.f32 %v337_v56, %v336_v52 }
  0xcb   : > { %v359_v58 = vadd.f32 %v358_v57, %v357_v55 }
  0xcd   : > { %v364_v60 = vsel %vm363_vm0, %v359_v58, 0.0 }
  0xce   : > { %v365_v61 = vsel %vm362_vm1, %v338_v59, %v364_v60 }
  0xcf   : > { %366 = vst [vmem:[%s184_s16] sm:$0xff] %v365_v61 }
  0xd0 PF: > { %s14_s12 = sadd.s32 1, %s587_s12  }
  0xd1   : > { %p11_p5 = scmp.ge.s32.totalorder %s14_s12, 4  }
  0xd3   :  { %13 = sbr.rel (!%p11_p5) target bundleno = 1 (0x1), region = 70 }

// kernel: nlayer_discriminator_forward.7
= control target key start
LH: loop header
LB: loop body
LE: loop exit
PB: predicated region body
PF: predicated region fallthrough
CT: control target
= control target key end

     0   :  { %s615_s12 = smov 0   ;;  %s692_s0 = inlined_call_operand.vmem [shape: bf16[32,256], index: 0, kind: input, shape index: {}]   ;;  %s693_s1 = inlined_call_operand.vmem [shape: bf16[256,128], index: 1, kind: input, shape index: {}]   ;;  %s694_s2 = inlined_call_operand.vmem [shape: bf16[32,128], index: 2, kind: output, shape index: {0}]   ;;  %s695_s3 = inlined_call_operand.vmem [shape: f32[16,128], index: 3, kind: output, shape index: {1}]  }
   0x1 LB: > { %s621_s13 = sadd.s32 4294967295, %s593_s12   ;;  %p474_p0 = scmp.ge.s32.totalorder %s593_s12, 1  ;;  %s593_s12 = sphi %s615_s12, %s14_s12  }
   0x2   : > { %p142_p1 = scmp.lt.s32.totalorder %s593_s12, 3 }
   0x4   : > { %p143_p2 = pnand %p474_p0, %p142_p1 }
   0x5   : > { %s475_s26 = sshll.u32 (!%p143_p2), %s621_s13, 1  ;;  %p184_p4 = scmp.lt.s32.totalorder (!%p143_p2), %s621_s13, 1 }
   0x6   : > { %146 = sbr.rel (%p143_p2) target bundleno = 199 (0xc7), region = 28  ;;  %p172_p3 = scmp.lt.s32.totalorder (!%p143_p2), %s475_s26, 3 }
   0xb   : > { %v565_v0 = vld [vmem:[%s693_s1 + $0x38] sm:$0xff]  ;;  %v564_v2 = vld [vmem:[%s693_s1 + $0x30] sm:$0xff]  ;;  %v563_v4 = vld [vmem:[%s693_s1 + $0x28] sm:$0xff]  ;;  %s697_s26 = smov (!%p172_p3, %s475_s26), 3  ;;  %v376_v36 = vlaneseq  ;;  %s699_s13 = smov (!%p184_p4, %s621_s13), 1 }
   0xc   : > { %v573_v1 = vld [vmem:[%s693_s1 + $0x78] sm:$0xff]  ;;  %328 = vmatpush.bf16.msra.mxu0 %v565_v0  ;;  %v572_v3 = vld [vmem:[%s693_s1 + $0x70] sm:$0xff]  ;;  %v571_v5 = vld [vmem:[%s693_s1 + $0x68] sm:$0xff]  ;;  %s555_s14 = sshll.u32 %s697_s26, 3  ;;  %s479_s27 = sshll.u32 %s697_s26, 2 }
   0xd   : > { %342 = vmatpush.bf16.msra.mxu1 %v573_v1  ;;  %v562_v6 = vld [vmem:[%s693_s1 + $0x20] sm:$0xff]  ;;  %v561_v8 = vld [vmem:[%s693_s1 + $0x18] sm:$0xff]  ;;  %v560_v10 = vld [vmem:[%s693_s1 + $0x10] sm:$0xff]  ;;  %s176_s21 = scalar_lea.vmem %s692_s0, %s555_s14  ;;  %s182_s30 = scalar_lea.vmem %s694_s2, %s479_s27  ;;  %v377_v41 = vshrl.u32 %v376_v36, 7 }
   0xe   : > { %v570_v7 = vld [vmem:[%s693_s1 + $0x60] sm:$0xff]  ;;  %v569_v9 = vld [vmem:[%s693_s1 + $0x58] sm:$0xff]  ;;  %v568_v11 = vld [vmem:[%s693_s1 + $0x50] sm:$0xff]  ;;  %s480_s26 = sshll.u32 %s699_s13, 3 }
   0xf   : > { %v559_v12 = vld [vmem:[%s693_s1 + $0x8] sm:$0xff]  ;;  %v558_v14 = vld [vmem:[%s693_s1] sm:$0xff]  ;;  %vm379_vm0 = vcmp.eq.s32.totalorder %v377_v41, 1  ;;  %vm378_vm1 = vcmp.eq.s32.totalorder %v377_v41, 0  ;;  %s187_s6 = scalar_lea.vmem %s695_s3, %s480_s26 }
  0x10   : > { %329 = vmatpush.bf16.msra.mxu0 %v564_v2  ;;  %v567_v13 = vld [vmem:[%s693_s1 + $0x48] sm:$0xff]  ;;  %v566_v15 = vld [vmem:[%s693_s1 + $0x40] sm:$0xff] }
  0x11   : > { %343 = vmatpush.bf16.msra.mxu1 %v572_v3  ;;  %v483_v16 = vld [vmem:[%s176_s21] sm:$0xf]  ;;  %v557_v17 = vld [vmem:[%s176_s21 + $0x4] sm:$0xf0]  ;;  %v556_v18 = vld [vmem:[%s176_s21 + $0x4] sm:$0xf] }
  0x12   : > { %v485_v19 = vld [vmem:[%s176_s21 + $0x8] sm:$0xf0]  ;;  %v484_v20 = vor.u32 %v557_v17, %v483_v16 }
  0x13   : > { %v488_v21 = vor.u32 %v556_v18, %v485_v19 }
  0x14   : > { %330 = vmatpush.bf16.msra.mxu0 %v563_v4 }
  0x15   : > { %344 = vmatpush.bf16.msra.mxu1 %v571_v5 }
  0x18   : > { %331 = vmatpush.bf16.msra.mxu0 %v562_v6 }
  0x19   : > { %345 = vmatpush.bf16.msra.mxu1 %v570_v7 }
  0x1c   : > { %332 = vmatpush.bf16.msra.mxu0 %v561_v8 }
  0x1d   : > { %346 = vmatpush.bf16.msra.mxu1 %v569_v9 }
  0x20   : > { %333 = vmatpush.bf16.msra.mxu0 %v560_v10 }
  0x21   : > { %347 = vmatpush.bf16.msra.mxu1 %v568_v11 }
  0x24   : > { %334 = vmatpush.bf16.msra.mxu0 %v559_v12 }
  0x25   : > { %348 = vmatpush.bf16.msra.mxu1 %v567_v13 }
  0x28   : > { %335 = vmatpush.bf16.msra.mxu0 %v558_v14 }
  0x29   : > { %349 = vmatpush.bf16.msra.mxu1 %v566_v15 }
  0x2b   : > { %336 = vmatmul.bf16.vlgmr.msra.gmra.mxu0 %v484_v20 }
  0x2c   : > { %350 = vmatmul.bf16.vlgmr.msra.gmra.mxu1 %v488_v21 }
  0xa8   : > { %v337_v22 = vpop.f32.mrf.mxu0 }
  0xa9   : > { %v351_v23 = vpop.f32.mrf.mxu1 }
  0xaa   : > { %v352_v24 = vadd.f32 %v351_v23, %v337_v22 }
  0xac   : > { %v367_v28 = vmul.f32 %v352_v24, %v352_v24 }
  0xb0   : > { %v339_v25 = vpop.f32.mrf.mxu0 }
  0xb1   : > { %v353_v26 = vpop.f32.mrf.mxu1 }
  0xb2   : > { %v354_v27 = vadd.f32 %v353_v26, %v339_v25 }
  0xb4   : > { %v577_v29 = vpack.c.bf16 %v354_v27, %v352_v24  ;;  %v360_v30 = vadd.f32 %v354_v27, %v352_v24  ;;  %v368_v31 = vmul.f32 %v354_v27, %v354_v27 }
  0xb6   : > { %578 = vst [vmem:[%s182_s30] sm:$0xff] %v577_v29   ;;  %v361_v32 = vrot.slane %v360_v30, 4  ;;  %v369_v33 = vadd.f32 %v368_v31, %v367_v28 }
  0xb8   : > { %v362_v34 = vadd.f32 %v361_v32, %v360_v30  ;;  %v370_v35 = vrot.slane %v369_v33, 4 }
  0xba   : > { %v363_v37 = vrot.slane %v362_v34, 2  ;;  %v371_v38 = vadd.f32 %v370_v35, %v369_v33 }
  0xbc   : > { %v364_v39 = vadd.f32 %v363_v37, %v362_v34  ;;  %v372_v40 = vrot.slane %v371_v38, 2 }
  0xbe   : > { %v373_v42 = vadd.f32 %v372_v40, %v371_v38  ;;  %v365_v43 = vrot.slane %v364_v39, 1 }
  0xc0   : > { %v374_v44 = vrot.slane %v373_v42, 1  ;;  %v366_v46 = vadd.f32 %v365_v43, %v364_v39 }
  0xc2   : > { %v375_v45 = vadd.f32 %v374_v44, %v373_v42 }
  0xc4   : > { %v380_v47 = vsel %vm379_vm0, %v375_v45, 0.0 }
  0xc5   : > { %v381_v48 = vsel %vm378_vm1, %v366_v46, %v380_v47 }
  0xc6   : > { %382 = vst [vmem:[%s187_s6] sm:$0xff] %v381_v48 }
  0xc7 PF: > { %s14_s12 = sadd.s32 1, %s593_s12  }
  0xc8   : > { %p11_p5 = scmp.ge.s32.totalorder %s14_s12, 4  }
  0xca   :  { %13 = sbr.rel (!%p11_p5) target bundleno = 1 (0x1), region = 70 }

// kernel: nlayer_discriminator_forward.8
= control target key start
LH: loop header
LB: loop body
LE: loop exit
PB: predicated region body
PF: predicated region fallthrough
CT: control target
= control target key end

     0   :  { %s873_s12 = smov 0   ;;  %s998_s0 = inlined_call_operand.vmem [shape: bf16[32,512], index: 0, kind: input, shape index: {}]   ;;  %s999_s1 = inlined_call_operand.vmem [shape: bf16[512,128], index: 1, kind: input, shape index: {}]   ;;  %s1000_s2 = inlined_call_operand.vmem [shape: bf16[32,128], index: 2, kind: output, shape index: {0}]   ;;  %s1001_s3 = inlined_call_operand.vmem [shape: f32[16,128], index: 3, kind: output, shape index: {1}]  }
   0x1 LB: > { %s879_s13 = sadd.s32 4294967295, %s851_s12   ;;  %p642_p0 = scmp.ge.s32.totalorder %s851_s12, 1  ;;  %s851_s12 = sphi %s873_s12, %s14_s12  }
   0x2   : > { %p142_p1 = scmp.lt.s32.totalorder %s851_s12, 3 }
   0x4   : > { %p143_p2 = pnand %p642_p0, %p142_p1 }
   0x5   : > { %s643_s11 = sshll.u32 (!%p143_p2), %s879_s13, 1  ;;  %p184_p4 = scmp.lt.s32.totalorder (!%p143_p2), %s879_s13, 1 }
   0x6   : > { %146 = sbr.rel (%p143_p2) target bundleno = 208 (0xd0), region = 28  ;;  %p172_p3 = scmp.lt.s32.totalorder (!%p143_p2), %s643_s11, 3 }
   0xb   : > { %v807_v0 = vld [vmem:[%s999_s1 + $0x38] sm:$0xff]  ;;  %v806_v4 = vld [vmem:[%s999_s1 + $0x30] sm:$0xff]  ;;  %v805_v8 = vld [vmem:[%s999_s1 + $0x28] sm:$0xff]  ;;  %s1003_s11 = smov (!%p172_p3, %s643_s11), 3  ;;  %s1005_s13 = smov (!%p184_p4, %s879_s13), 1 }
   0xc   : > { %v815_v1 = vld [vmem:[%s999_s1 + $0x78] sm:$0xff]  ;;  %468 = vmatpush.bf16.msra.mxu0 %v807_v0  ;;  %v814_v5 = vld [vmem:[%s999_s1 + $0x70] sm:$0xff]  ;;  %v813_v9 = vld [vmem:[%s999_s1 + $0x68] sm:$0xff]  ;;  %s795_s14 = sshll.u32 %s1003_s11, 4  ;;  %s647_s7 = sshll.u32 %s1003_s11, 2 }
   0xd   : > { %v823_v2 = vld [vmem:[%s999_s1 + $0xb8] sm:$0xff]  ;;  %482 = vmatpush.bf16.msra.mxu1 %v815_v1  ;;  %v822_v6 = vld [vmem:[%s999_s1 + $0xb0] sm:$0xff]  ;;  %v821_v10 = vld [vmem:[%s999_s1 + $0xa8] sm:$0xff]  ;;  %s176_s21 = scalar_lea.vmem %s998_s0, %s795_s14  ;;  %s182_s10 = scalar_lea.vmem %s1000_s2, %s647_s7 }
   0xe   : > { %v831_v3 = vld [vmem:[%s999_s1 + $0xf8] sm:$0xff]  ;;  %496 = vmatpush.bf16.msra.mxu2 %v823_v2  ;;  %v830_v7 = vld [vmem:[%s999_s1 + $0xf0] sm:$0xff]  ;;  %v829_v11 = vld [vmem:[%s999_s1 + $0xe8] sm:$0xff]  ;;  %v544_v2 = vlaneseq  ;;  %s648_s11 = sshll.u32 %s1005_s13, 3 }
   0xf   : > { %510 = vmatpush.bf16.msra.mxu3 %v831_v3  ;;  %v804_v12 = vld [vmem:[%s999_s1 + $0x20] sm:$0xff]  ;;  %v803_v16 = vld [vmem:[%s999_s1 + $0x18] sm:$0xff]  ;;  %v802_v20 = vld [vmem:[%s999_s1 + $0x10] sm:$0xff]  ;;  %s187_s16 = scalar_lea.vmem %s1001_s3, %s648_s11 }
  0x10   : > { %469 = vmatpush.bf16.msra.mxu0 %v806_v4  ;;  %v812_v13 = vld [vmem:[%s999_s1 + $0x60] sm:$0xff]  ;;  %v811_v17 = vld [vmem:[%s999_s1 + $0x58] sm:$0xff]  ;;  %v810_v21 = vld [vmem:[%s999_s1 + $0x50] sm:$0xff] }
  0x11   : > { %483 = vmatpush.bf16.msra.mxu1 %v814_v5  ;;  %v820_v14 = vld [vmem:[%s999_s1 + $0xa0] sm:$0xff]  ;;  %v819_v18 = vld [vmem:[%s999_s1 + $0x98] sm:$0xff]  ;;  %v818_v22 = vld [vmem:[%s999_s1 + $0x90] sm:$0xff] }
  0x12   : > { %497 = vmatpush.bf16.msra.mxu2 %v822_v6  ;;  %v828_v15 = vld [vmem:[%s999_s1 + $0xe0] sm:$0xff]  ;;  %v827_v19 = vld [vmem:[%s999_s1 + $0xd8] sm:$0xff]  ;;  %v826_v23 = vld [vmem:[%s999_s1 + $0xd0] sm:$0xff] }
  0x13   : > { %511 = vmatpush.bf16.msra.mxu3 %v830_v7  ;;  %v801_v24 = vld [vmem:[%s999_s1 + $0x8] sm:$0xff]  ;;  %v800_v28 = vld [vmem:[%s999_s1] sm:$0xff]  ;;  %v798_v33 = vld [vmem:[%s176_s21 + $0xc] sm:$0xf0]  ;;  %v545_v7 = vshrl.u32 %v544_v2, 7 }
  0x14   : > { %470 = vmatpush.bf16.msra.mxu0 %v805_v8  ;;  %v809_v25 = vld [vmem:[%s999_s1 + $0x48] sm:$0xff]  ;;  %v808_v29 = vld [vmem:[%s999_s1 + $0x40] sm:$0xff]  ;;  %v653_v35 = vld [vmem:[%s176_s21 + $0x10] sm:$0xf0] }
  0x15   : > { %484 = vmatpush.bf16.msra.mxu1 %v813_v9  ;;  %v817_v26 = vld [vmem:[%s999_s1 + $0x88] sm:$0xff]  ;;  %v816_v30 = vld [vmem:[%s999_s1 + $0x80] sm:$0xff]  ;;  %v799_v37 = vld [vmem:[%s176_s21 + $0x14] sm:$0xf0]  ;;  %vm547_vm0 = vcmp.eq.s32.totalorder %v545_v7, 1  ;;  %vm546_vm1 = vcmp.eq.s32.totalorder %v545_v7, 0 }
  0x16   : > { %498 = vmatpush.bf16.msra.mxu2 %v821_v10  ;;  %v825_v27 = vld [vmem:[%s999_s1 + $0xc8] sm:$0xff]  ;;  %v824_v31 = vld [vmem:[%s999_s1 + $0xc0] sm:$0xff]  ;;  %v661_v39 = vld [vmem:[%s176_s21 + $0x18] sm:$0xf0] }
  0x17   : > { %512 = vmatpush.bf16.msra.mxu3 %v829_v11  ;;  %v651_v32 = vld [vmem:[%s176_s21] sm:$0xf]  ;;  %v796_v34 = vld [vmem:[%s176_s21 + $0x4] sm:$0xf]  ;;  %v659_v36 = vld [vmem:[%s176_s21 + $0x8] sm:$0xf] }
  0x18   : > { %471 = vmatpush.bf16.msra.mxu0 %v804_v12  ;;  %v797_v38 = vld [vmem:[%s176_s21 + $0xc] sm:$0xf]  ;;  %v652_v40 = vor.u32 %v798_v33, %v651_v32  ;;  %v656_v41 = vor.u32 %v796_v34, %v653_v35  ;;  %v660_v42 = vor.u32 %v799_v37, %v659_v36 }
  0x19   : > { %485 = vmatpush.bf16.msra.mxu1 %v812_v13  ;;  %v664_v43 = vor.u32 %v797_v38, %v661_v39 }
  0x1a   : > { %499 = vmatpush.bf16.msra.mxu2 %v820_v14 }
  0x1b   : > { %513 = vmatpush.bf16.msra.mxu3 %v828_v15 }
  0x1c   : > { %472 = vmatpush.bf16.msra.mxu0 %v803_v16 }
  0x1d   : > { %486 = vmatpush.bf16.msra.mxu1 %v811_v17 }
  0x1e   : > { %500 = vmatpush.bf16.msra.mxu2 %v819_v18 }
  0x1f   : > { %514 = vmatpush.bf16.msra.mxu3 %v827_v19 }
  0x20   : > { %473 = vmatpush.bf16.msra.mxu0 %v802_v20 }
  0x21   : > { %487 = vmatpush.bf16.msra.mxu1 %v810_v21 }
  0x22   : > { %501 = vmatpush.bf16.msra.mxu2 %v818_v22 }
  0x23   : > { %515 = vmatpush.bf16.msra.mxu3 %v826_v23 }
  0x24   : > { %474 = vmatpush.bf16.msra.mxu0 %v801_v24 }
  0x25   : > { %488 = vmatpush.bf16.msra.mxu1 %v809_v25 }
  0x26   : > { %502 = vmatpush.bf16.msra.mxu2 %v817_v26 }
  0x27   : > { %516 = vmatpush.bf16.msra.mxu3 %v825_v27 }
  0x28   : > { %475 = vmatpush.bf16.msra.mxu0 %v800_v28 }
  0x29   : > { %489 = vmatpush.bf16.msra.mxu1 %v808_v29 }
  0x2a   : > { %503 = vmatpush.bf16.msra.mxu2 %v816_v30 }
  0x2b   : > { %517 = vmatpush.bf16.msra.mxu3 %v824_v31  ;;  %476 = vmatmul.bf16.vlgmr.msra.gmra.mxu0 %v652_v40 }
  0x2c   : > { %490 = vmatmul.bf16.vlgmr.msra.gmra.mxu1 %v656_v41 }
  0x2d   : > { %504 = vmatmul.bf16.vlgmr.msra.gmra.mxu2 %v660_v42 }
  0x2e   : > { %518 = vmatmul.bf16.vlgmr.msra.gmra.mxu3 %v664_v43 }
  0xa8   : > { %v477_v44 = vpop.f32.mrf.mxu0 }
  0xa9   : > { %v491_v45 = vpop.f32.mrf.mxu1 }
  0xaa   : > { %v492_v48 = vadd.f32 %v491_v45, %v477_v44 }
  0xb0   : > { %v505_v46 = vpop.f32.mrf.mxu2  ;;  %v479_v49 = vpop.f32.mrf.mxu0 }
  0xb1   : > { %v519_v47 = vpop.f32.mrf.mxu3  ;;  %v493_v50 = vpop.f32.mrf.mxu1  ;;  %v506_v51 = vadd.f32 %v505_v46, %v492_v48 }
  0xb2   : > { %v494_v52 = vadd.f32 %v493_v50, %v479_v49 }
  0xb3   : > { %v520_v54 = vadd.f32 %v519_v47, %v506_v51 }
  0xb5   : > { %v535_v58 = vmul.f32 %v520_v54, %v520_v54 }
  0xb8   : > { %v507_v53 = vpop.f32.mrf.mxu2 }
  0xb9   : > { %v508_v55 = vadd.f32 %v507_v53, %v494_v52  ;;  %v521_v56 = vpop.f32.mrf.mxu3 }
  0xbb   : > { %v522_v57 = vadd.f32 %v521_v56, %v508_v55 }
  0xbd   : > { %v835_v59 = vpack.c.bf16 %v522_v57, %v520_v54  ;;  %v528_v60 = vadd.f32 %v522_v57, %v520_v54  ;;  %v536_v61 = vmul.f32 %v522_v57, %v522_v57 }
  0xbf   : > { %836 = vst [vmem:[%s182_s10] sm:$0xff] %v835_v59   ;;  %v529_v62 = vrot.slane %v528_v60, 4  ;;  %v537_v63 = vadd.f32 %v536_v61, %v535_v58 }
  0xc1   : > { %v530_v0 = vadd.f32 %v529_v62, %v528_v60  ;;  %v538_v1 = vrot.slane %v537_v63, 4 }
  0xc3   : > { %v531_v3 = vrot.slane %v530_v0, 2  ;;  %v539_v4 = vadd.f32 %v538_v1, %v537_v63 }
  0xc5   : > { %v532_v5 = vadd.f32 %v531_v3, %v530_v0  ;;  %v540_v6 = vrot.slane %v539_v4, 2 }
  0xc7   : > { %v541_v8 = vadd.f32 %v540_v6, %v539_v4  ;;  %v533_v9 = vrot.slane %v532_v5, 1 }
  0xc9   : > { %v542_v10 = vrot.slane %v541_v8, 1  ;;  %v534_v12 = vadd.f32 %v533_v9, %v532_v5 }
  0xcb   : > { %v543_v11 = vadd.f32 %v542_v10, %v541_v8 }
  0xcd   : > { %v548_v13 = vsel %vm547_vm0, %v543_v11, 0.0 }
  0xce   : > { %v549_v14 = vsel %vm546_vm1, %v534_v12, %v548_v13 }
  0xcf   : > { %550 = vst [vmem:[%s187_s16] sm:$0xff] %v549_v14 }
  0xd0 PF: > { %s14_s12 = sadd.s32 1, %s851_s12  }
  0xd1   : > { %p11_p5 = scmp.ge.s32.totalorder %s14_s12, 4  }
  0xd3   :  { %13 = sbr.rel (!%p11_p5) target bundleno = 1 (0x1), region = 70 }

// kernel: nlayer_discriminator_forward.9
= control target key start
LH: loop header
LB: loop body
LE: loop exit
PB: predicated region body
PF: predicated region fallthrough
CT: control target
= control target key end

     0   :  { %s1326_s1 = inlined_call_operand.vmem [shape: bf16[1024,128], index: 1, kind: input, shape index: {}]   ;;  %s1327_s2 = inlined_call_operand.vmem [shape: f32[1,128], index: 2, kind: input, shape index: {}]   ;;  %s1328_s0 = inlined_call_operand.vmem [shape: bf16[16,1024], index: 0, kind: input, shape index: {}]   ;;  %s1329_s3 = inlined_call_operand.vmem [shape: f32[16,128], index: 3, kind: output, shape index: {}]  }
   0x1   :  { %v999_v0 = vld [vmem:[%s1326_s1 + $0x38] sm:$0xff]  ;;  %v998_v4 = vld [vmem:[%s1326_s1 + $0x30] sm:$0xff]  ;;  %v997_v8 = vld [vmem:[%s1326_s1 + $0x28] sm:$0xff] }
   0x2   :  { %v1007_v1 = vld [vmem:[%s1326_s1 + $0x78] sm:$0xff]  ;;  %578 = vmatpush.bf16.msra.mxu0 %v999_v0  ;;  %v1006_v5 = vld [vmem:[%s1326_s1 + $0x70] sm:$0xff]  ;;  %v1005_v9 = vld [vmem:[%s1326_s1 + $0x68] sm:$0xff] }
   0x3   :  { %v1015_v2 = vld [vmem:[%s1326_s1 + $0xb8] sm:$0xff]  ;;  %592 = vmatpush.bf16.msra.mxu1 %v1007_v1  ;;  %v1014_v6 = vld [vmem:[%s1326_s1 + $0xb0] sm:$0xff]  ;;  %v1013_v10 = vld [vmem:[%s1326_s1 + $0xa8] sm:$0xff] }
   0x4   :  { %v1023_v3 = vld [vmem:[%s1326_s1 + $0xf8] sm:$0xff]  ;;  %606 = vmatpush.bf16.msra.mxu2 %v1015_v2  ;;  %v1022_v7 = vld [vmem:[%s1326_s1 + $0xf0] sm:$0xff]  ;;  %v1021_v11 = vld [vmem:[%s1326_s1 + $0xe8] sm:$0xff] }
   0x5   :  { %620 = vmatpush.bf16.msra.mxu3 %v1023_v3  ;;  %v996_v12 = vld [vmem:[%s1326_s1 + $0x20] sm:$0xff]  ;;  %v995_v16 = vld [vmem:[%s1326_s1 + $0x18] sm:$0xff]  ;;  %v994_v20 = vld [vmem:[%s1326_s1 + $0x10] sm:$0xff] }
   0x6   :  { %579 = vmatpush.bf16.msra.mxu0 %v998_v4  ;;  %v1004_v13 = vld [vmem:[%s1326_s1 + $0x60] sm:$0xff]  ;;  %v1003_v17 = vld [vmem:[%s1326_s1 + $0x58] sm:$0xff]  ;;  %v1002_v21 = vld [vmem:[%s1326_s1 + $0x50] sm:$0xff] }
   0x7   :  { %593 = vmatpush.bf16.msra.mxu1 %v1006_v5  ;;  %v1012_v14 = vld [vmem:[%s1326_s1 + $0xa0] sm:$0xff]  ;;  %v1011_v18 = vld [vmem:[%s1326_s1 + $0x98] sm:$0xff]  ;;  %v1010_v22 = vld [vmem:[%s1326_s1 + $0x90] sm:$0xff] }
   0x8   :  { %607 = vmatpush.bf16.msra.mxu2 %v1014_v6  ;;  %v1020_v15 = vld [vmem:[%s1326_s1 + $0xe0] sm:$0xff]  ;;  %v1019_v19 = vld [vmem:[%s1326_s1 + $0xd8] sm:$0xff]  ;;  %v1018_v23 = vld [vmem:[%s1326_s1 + $0xd0] sm:$0xff] }
   0x9   :  { %621 = vmatpush.bf16.msra.mxu3 %v1022_v7  ;;  %v993_v24 = vld [vmem:[%s1326_s1 + $0x8] sm:$0xff]  ;;  %v992_v28 = vld [vmem:[%s1326_s1] sm:$0xff]  ;;  %v1031_v32 = vld [vmem:[%s1326_s1 + $0x138] sm:$0xff] }
   0xa   :  { %580 = vmatpush.bf16.msra.mxu0 %v997_v8  ;;  %v1001_v25 = vld [vmem:[%s1326_s1 + $0x48] sm:$0xff]  ;;  %v1000_v29 = vld [vmem:[%s1326_s1 + $0x40] sm:$0xff]  ;;  %v1039_v33 = vld [vmem:[%s1326_s1 + $0x178] sm:$0xff] }
   0xb   :  { %594 = vmatpush.bf16.msra.mxu1 %v1005_v9  ;;  %v1009_v26 = vld [vmem:[%s1326_s1 + $0x88] sm:$0xff]  ;;  %v1008_v30 = vld [vmem:[%s1326_s1 + $0x80] sm:$0xff]  ;;  %v1047_v42 = vld [vmem:[%s1326_s1 + $0x1b8] sm:$0xff] }
   0xc   :  { %608 = vmatpush.bf16.msra.mxu2 %v1013_v10  ;;  %v1017_v27 = vld [vmem:[%s1326_s1 + $0xc8] sm:$0xff]  ;;  %v1016_v31 = vld [vmem:[%s1326_s1 + $0xc0] sm:$0xff]  ;;  %v1055_v43 = vld [vmem:[%s1326_s1 + $0x1f8] sm:$0xff] }
   0xd   :  { %622 = vmatpush.bf16.msra.mxu3 %v1021_v11  ;;  %v706_v34 = vld [vmem:[%s1328_s0 + $0x8] sm:$0xf]  ;;  %v698_v36 = vld [vmem:[%s1328_s0] sm:$0xf]  ;;  %v985_v38 = vld [vmem:[%s1328_s0 + $0xc] sm:$0xf] }
   0xe   :  { %581 = vmatpush.bf16.msra.mxu0 %v996_v12  ;;  %v989_v35 = vld [vmem:[%s1328_s0 + $0x24] sm:$0xf0]  ;;  %v988_v37 = vld [vmem:[%s1328_s0 + $0x1c] sm:$0xf0]  ;;  %v708_v39 = vld [vmem:[%s1328_s0 + $0x28] sm:$0xf0] }
   0xf   :  { %595 = vmatpush.bf16.msra.mxu1 %v1004_v13  ;;  %v984_v40 = vld [vmem:[%s1328_s0 + $0x4] sm:$0xf]  ;;  %v707_v44 = vor.u32 %v989_v35, %v706_v34  ;;  %v699_v45 = vor.u32 %v988_v37, %v698_v36  ;;  %v711_v46 = vor.u32 %v985_v38, %v708_v39  ;;  %v1030_v48 = vld [vmem:[%s1326_s1 + $0x130] sm:$0xff]  ;;  %v1029_v52 = vld [vmem:[%s1326_s1 + $0x128] sm:$0xff] }
  0x10   :  { %609 = vmatpush.bf16.msra.mxu2 %v1012_v14  ;;  %v700_v41 = vld [vmem:[%s1328_s0 + $0x20] sm:$0xf0]  ;;  %v1038_v49 = vld [vmem:[%s1326_s1 + $0x170] sm:$0xff]  ;;  %v1037_v53 = vld [vmem:[%s1326_s1 + $0x168] sm:$0xff] }
  0x11   :  { %623 = vmatpush.bf16.msra.mxu3 %v1020_v15  ;;  %v703_v47 = vor.u32 %v984_v40, %v700_v41  ;;  %v1046_v50 = vld [vmem:[%s1326_s1 + $0x1b0] sm:$0xff]  ;;  %v1045_v54 = vld [vmem:[%s1326_s1 + $0x1a8] sm:$0xff]  ;;  %v1028_v56 = vld [vmem:[%s1326_s1 + $0x120] sm:$0xff] }
  0x12   :  { %582 = vmatpush.bf16.msra.mxu0 %v995_v16  ;;  %v1054_v51 = vld [vmem:[%s1326_s1 + $0x1f0] sm:$0xff]  ;;  %v1053_v55 = vld [vmem:[%s1326_s1 + $0x1e8] sm:$0xff]  ;;  %v1036_v57 = vld [vmem:[%s1326_s1 + $0x160] sm:$0xff] }
  0x13   :  { %596 = vmatpush.bf16.msra.mxu1 %v1003_v17  ;;  %v1044_v58 = vld [vmem:[%s1326_s1 + $0x1a0] sm:$0xff]  ;;  %v1027_v60 = vld [vmem:[%s1326_s1 + $0x118] sm:$0xff]  ;;  %v1026_v0 = vld [vmem:[%s1326_s1 + $0x110] sm:$0xff] }
  0x14   :  { %610 = vmatpush.bf16.msra.mxu2 %v1011_v18  ;;  %v1052_v59 = vld [vmem:[%s1326_s1 + $0x1e0] sm:$0xff]  ;;  %v1035_v61 = vld [vmem:[%s1326_s1 + $0x158] sm:$0xff]  ;;  %v1034_v1 = vld [vmem:[%s1326_s1 + $0x150] sm:$0xff] }
  0x15   :  { %624 = vmatpush.bf16.msra.mxu3 %v1019_v19  ;;  %v1043_v62 = vld [vmem:[%s1326_s1 + $0x198] sm:$0xff]  ;;  %v1042_v2 = vld [vmem:[%s1326_s1 + $0x190] sm:$0xff]  ;;  %v1025_v4 = vld [vmem:[%s1326_s1 + $0x108] sm:$0xff] }
  0x16   :  { %583 = vmatpush.bf16.msra.mxu0 %v994_v20  ;;  %v1051_v63 = vld [vmem:[%s1326_s1 + $0x1d8] sm:$0xff]  ;;  %v1050_v3 = vld [vmem:[%s1326_s1 + $0x1d0] sm:$0xff]  ;;  %v1033_v5 = vld [vmem:[%s1326_s1 + $0x148] sm:$0xff] }
  0x17   :  { %597 = vmatpush.bf16.msra.mxu1 %v1002_v21  ;;  %v1041_v6 = vld [vmem:[%s1326_s1 + $0x188] sm:$0xff]  ;;  %v1024_v8 = vld [vmem:[%s1326_s1 + $0x100] sm:$0xff]  ;;  %v714_v12 = vld [vmem:[%s1328_s0 + $0x10] sm:$0xf] }
  0x18   :  { %611 = vmatpush.bf16.msra.mxu2 %v1010_v22  ;;  %v1049_v7 = vld [vmem:[%s1326_s1 + $0x1c8] sm:$0xff]  ;;  %v1032_v9 = vld [vmem:[%s1326_s1 + $0x140] sm:$0xff]  ;;  %v990_v13 = vld [vmem:[%s1328_s0 + $0x2c] sm:$0xf0] }
  0x19   :  { %625 = vmatpush.bf16.msra.mxu3 %v1018_v23  ;;  %v1040_v10 = vld [vmem:[%s1326_s1 + $0x180] sm:$0xff]  ;;  %v986_v14 = vld [vmem:[%s1328_s0 + $0x14] sm:$0xf]  ;;  %v722_v16 = vld [vmem:[%s1328_s0 + $0x18] sm:$0xf]  ;;  %v715_v20 = vor.u32 %v990_v13, %v714_v12 }
  0x1a   :  { %584 = vmatpush.bf16.msra.mxu0 %v993_v24  ;;  %v1048_v11 = vld [vmem:[%s1326_s1 + $0x1c0] sm:$0xff]  ;;  %v716_v15 = vld [vmem:[%s1328_s0 + $0x30] sm:$0xf0]  ;;  %v991_v17 = vld [vmem:[%s1328_s0 + $0x34] sm:$0xf0] }
  0x1b   :  { %598 = vmatpush.bf16.msra.mxu1 %v1001_v25  ;;  %v987_v18 = vld [vmem:[%s1328_s0 + $0x1c] sm:$0xf]  ;;  %v719_v21 = vor.u32 %v986_v14, %v716_v15  ;;  %v723_v22 = vor.u32 %v991_v17, %v722_v16  ;;  %v1056_v25 = vld [vmem:[%s1327_s2] ss:$0 sm:$0xff] }
  0x1c   :  { %612 = vmatpush.bf16.msra.mxu2 %v1009_v26  ;;  %v724_v19 = vld [vmem:[%s1328_s0 + $0x38] sm:$0xf0] }
  0x1d   :  { %626 = vmatpush.bf16.msra.mxu3 %v1017_v27  ;;  %v727_v23 = vor.u32 %v987_v18, %v724_v19 }
  0x1e   :  { %585 = vmatpush.bf16.msra.mxu0 %v992_v28 }
  0x1f   :  { %599 = vmatpush.bf16.msra.mxu1 %v1000_v29 }
  0x20   :  { %613 = vmatpush.bf16.msra.mxu2 %v1008_v30 }
  0x21   :  { %627 = vmatpush.bf16.msra.mxu3 %v1016_v31  ;;  %586 = vmatmul.bf16.vlgmr.msra.gmra.mxu0 %v699_v45 }
  0x22   :  { %634 = vmatpush.bf16.msrb.mxu0 %v1031_v32  ;;  %600 = vmatmul.bf16.vlgmr.msra.gmra.mxu1 %v703_v47 }
  0x23   :  { %648 = vmatpush.bf16.msrb.mxu1 %v1039_v33  ;;  %614 = vmatmul.bf16.vlgmr.msra.gmra.mxu2 %v707_v44 }
  0x24   :  { %662 = vmatpush.bf16.msrb.mxu2 %v1047_v42  ;;  %628 = vmatmul.bf16.vlgmr.msra.gmra.mxu3 %v711_v46 }
  0x25   :  { %676 = vmatpush.bf16.msrb.mxu3 %v1055_v43 }
  0x26   :  { %635 = vmatpush.bf16.msrb.mxu0 %v1030_v48 }
  0x27   :  { %649 = vmatpush.bf16.msrb.mxu1 %v1038_v49 }
  0x28   :  { %663 = vmatpush.bf16.msrb.mxu2 %v1046_v50 }
  0x29   :  { %677 = vmatpush.bf16.msrb.mxu3 %v1054_v51 }
  0x2a   :  { %636 = vmatpush.bf16.msrb.mxu0 %v1029_v52 }
  0x2b   :  { %650 = vmatpush.bf16.msrb.mxu1 %v1037_v53 }
  0x2c   :  { %664 = vmatpush.bf16.msrb.mxu2 %v1045_v54 }
  0x2d   :  { %678 = vmatpush.bf16.msrb.mxu3 %v1053_v55 }
  0x2e   :  { %637 = vmatpush.bf16.msrb.mxu0 %v1028_v56 }
  0x2f   :  { %651 = vmatpush.bf16.msrb.mxu1 %v1036_v57 }
  0x30   :  { %665 = vmatpush.bf16.msrb.mxu2 %v1044_v58 }
  0x31   :  { %679 = vmatpush.bf16.msrb.mxu3 %v1052_v59 }
  0x32   :  { %638 = vmatpush.bf16.msrb.mxu0 %v1027_v60 }
  0x33   :  { %652 = vmatpush.bf16.msrb.mxu1 %v1035_v61 }
  0x34   :  { %666 = vmatpush.bf16.msrb.mxu2 %v1043_v62 }
  0x35   :  { %680 = vmatpush.bf16.msrb.mxu3 %v1051_v63 }
  0x36   :  { %639 = vmatpush.bf16.msrb.mxu0 %v1026_v0 }
  0x37   :  { %653 = vmatpush.bf16.msrb.mxu1 %v1034_v1 }
  0x38   :  { %667 = vmatpush.bf16.msrb.mxu2 %v1042_v2 }
  0x39   :  { %681 = vmatpush.bf16.msrb.mxu3 %v1050_v3 }
  0x3a   :  { %640 = vmatpush.bf16.msrb.mxu0 %v1025_v4 }
  0x3b   :  { %654 = vmatpush.bf16.msrb.mxu1 %v1033_v5 }
  0x3c   :  { %668 = vmatpush.bf16.msrb.mxu2 %v1041_v6 }
  0x3d   :  { %682 = vmatpush.bf16.msrb.mxu3 %v1049_v7 }
  0x3e   :  { %641 = vmatpush.bf16.msrb.mxu0 %v1024_v8 }
  0x3f   :  { %655 = vmatpush.bf16.msrb.mxu1 %v1032_v9 }
  0x40   :  { %669 = vmatpush.bf16.msrb.mxu2 %v1040_v10 }
  0x41   :  { %683 = vmatpush.bf16.msrb.mxu3 %v1048_v11  ;;  %642 = vmatmul.bf16.vlgmr.msrb.gmra.mxu0 %v715_v20 }
  0x42   :  { %656 = vmatmul.bf16.vlgmr.msrb.gmra.mxu1 %v719_v21 }
  0x43   :  { %670 = vmatmul.bf16.vlgmr.msrb.gmra.mxu2 %v723_v22 }
  0x44   :  { %684 = vmatmul.bf16.vlgmr.msrb.gmra.mxu3 %v727_v23 }
  0x9e   :  { %v587_v24 = vpop.f32.mrf.mxu0 }
  0x9f   :  { %v601_v26 = vpop.f32.mrf.mxu1  ;;  %v588_v27 = vadd.f32 %v1056_v25, %v587_v24 }
  0xa1   :  { %v602_v30 = vadd.f32 %v601_v26, %v588_v27 }
  0xa6   :  { %v615_v28 = vpop.f32.mrf.mxu2  ;;  %v589_v31 = vpop.f32.mrf.mxu0 }
  0xa7   :  { %v629_v29 = vpop.f32.mrf.mxu3  ;;  %v603_v32 = vpop.f32.mrf.mxu1  ;;  %v616_v33 = vadd.f32 %v615_v28, %v602_v30  ;;  %v590_v34 = vadd.f32 %v1056_v25, %v589_v31 }
  0xa9   :  { %v630_v37 = vadd.f32 %v629_v29, %v616_v33  ;;  %v604_v38 = vadd.f32 %v603_v32, %v590_v34 }
  0xae   :  { %v617_v35 = vpop.f32.mrf.mxu2 }
  0xaf   :  { %v631_v36 = vpop.f32.mrf.mxu3  ;;  %v618_v42 = vadd.f32 %v617_v35, %v604_v38 }
  0xb1   :  { %v632_v46 = vadd.f32 %v631_v36, %v618_v42 }
  0xbe   :  { %v643_v39 = vpop.f32.mrf.mxu0 }
  0xbf   :  { %v644_v40 = vadd.f32 %v643_v39, %v630_v37  ;;  %v657_v41 = vpop.f32.mrf.mxu1 }
  0xc1   :  { %v658_v43 = vadd.f32 %v657_v41, %v644_v40 }
  0xc6   :  { %v671_v44 = vpop.f32.mrf.mxu2  ;;  %v645_v48 = vpop.f32.mrf.mxu0 }
  0xc7   :  { %v685_v45 = vpop.f32.mrf.mxu3  ;;  %v672_v47 = vadd.f32 %v671_v44, %v658_v43  ;;  %v646_v50 = vadd.f32 %v645_v48, %v632_v46  ;;  %v659_v51 = vpop.f32.mrf.mxu1 }
  0xc9   :  { %v686_v49 = vadd.f32 %v685_v45, %v672_v47  ;;  %v660_v52 = vadd.f32 %v659_v51, %v646_v50 }
  0xcb   :  { %690 = vst [vmem:[%s1329_s3] sm:$0xff] %v686_v49 }
  0xce   :  { %v673_v53 = vpop.f32.mrf.mxu2 }
  0xcf   :  { %v674_v54 = vadd.f32 %v673_v53, %v660_v52  ;;  %v687_v55 = vpop.f32.mrf.mxu3 }
  0xd1   :  { %v688_v56 = vadd.f32 %v687_v55, %v674_v54 }
  0xd3   :  { %691 = vst [vmem:[%s1329_s3 + $0x8] sm:$0xff] %v688_v56 }

</bundles_post_ra>
